<compile_context>
chip_gen: v5e
topology: v5e:2x2
jax: 0.10.0
libtpu: 0.0.40
codegen_flags: <defaults>
</compile_context>

<pallas_src>
import functools

import jax
import jax.numpy as jnp
import numpy as np
from jax.experimental import pallas as pl
from jax.experimental.pallas import tpu as pltpu


# ----------------------------------------------------------------------------- kernel ---
def aspp_kernel(xp_ref,                       # (1, Cin, Lin)   bf16  padded + flattened input
                w1_ref, b1_ref,               # (Cout, Cin)     bf16, (Cout, 1) f32
                w6_ref, b6_ref,               # (Cout, 9*Cin)   bf16, (Cout, 1) f32
                w12_ref, b12_ref,             # (Cout, 9*Cin)   bf16, (Cout, 1) f32
                p1_ref, p6_ref, p12_ref,      # (Cout, Cout)    bf16  wproj^T per-branch blocks
                pbias_ref,                    # (1, Cout, 1)    f32   bproj + pooled-branch fold
                o_ref,                        # (1, Cout, H*Wp) f32
                *, H, W, pad, dilations):
    """One batch element per grid step.  Spatial axis (length H*Wp) sits on lanes."""
    Wp = W + 2 * pad
    L = H * Wp
    d_a, d_b = dilations

    def tap(d, ky, kx):
        # conv tap (ky, kx) at dilation d for all L output positions: a contiguous slice
        # of the flattened padded image (offset derived from padding==dilation semantics).
        s = (pad - d + d * ky) * Wp + (pad - d + d * kx)
        return xp_ref[0, :, s:s + L]                                   # (Cin, L) bf16

    def conv_bn_relu(w, b, rhs):
        y = jnp.dot(w, rhs, preferred_element_type=jnp.float32) + b    # f32 accumulate
        return jnp.maximum(y, 0.0).astype(jnp.bfloat16)                # bf16 for next MXU

    def im2col(d):
        # stack the 9 shifted slabs along channels -> single K = 9*Cin matmul per branch
        return jnp.concatenate(
            [tap(d, ky, kx) for ky in range(3) for kx in range(3)], axis=0)

    y1 = conv_bn_relu(w1_ref[...], b1_ref[...], tap(0, 0, 0))          # 1x1 (center tap)
    y6 = conv_bn_relu(w6_ref[...], b6_ref[...], im2col(d_a))           # 3x3, dilation 6
    y12 = conv_bn_relu(w12_ref[...], b12_ref[...], im2col(d_b))        # 3x3, dilation 12

    # final 1x1 projection, split per branch (no concat); pooled branch + bproj live in pbias
    acc = pbias_ref[0]                                                 # (Cout, 1) broadcasts
    acc = acc + jnp.dot(p1_ref[...], y1, preferred_element_type=jnp.float32)
    acc = acc + jnp.dot(p6_ref[...], y6, preferred_element_type=jnp.float32)
    acc = acc + jnp.dot(p12_ref[...], y12, preferred_element_type=jnp.float32)
    o_ref[0] = jnp.maximum(acc, 0.0).astype(o_ref.dtype)


# ---------------------------------------------------------------------------- wrapper ---
def aspp_forward(x_nchw, params, dilations=(6, 12)):
    """ASPP forward.  x_nchw: (N, Cin, H, W) f32.  Returns (N, Cout, H, W) f32."""
    x = x_nchw.astype(jnp.float32)
    N, Cin, H, W = x.shape
    Cout = params["w1"].shape[-1]
    hi = jax.lax.Precision.HIGHEST
    bf = jnp.bfloat16

    pad = max(dilations)
    Hp, Wp = H + 2 * pad, W + 2 * pad
    L = H * Wp                                    # flattened per-image output length (5*128)

    # ---- image-pooling branch (global mean -> 1x1 ConvBNReLU -> bilinear from 1x1 ==
    #      spatially constant): fold its projection contribution + bproj into a per-image
    #      bias so the kernel never materializes or upsamples it.
    mean = jnp.mean(x, axis=(2, 3))                                              # (N, Cin)
    pooled = jax.nn.relu(jnp.dot(mean, params["wp"], precision=hi) + params["bp"])
    pbias = jnp.dot(pooled, params["wproj"][3 * Cout:], precision=hi) + params["bproj"]
    pbias = pbias[:, :, None].astype(jnp.float32)                                # (N, Cout, 1)

    # ---- single spatial pad to the max dilation, flattened so (H*Wp) is the lane axis.
    xp = jnp.pad(x, ((0, 0), (0, 0), (pad, pad), (pad, pad)))
    lin = Hp * Wp + 2 * pad                       # largest tap-slice end = Hp*Wp + 2*pad
    lin = ((lin + 127) // 128) * 128              # lane-align the single input DMA
    xpf = jnp.pad(xp.reshape(N, Cin, Hp * Wp),
                  ((0, 0), (0, 0), (0, lin - Hp * Wp))).astype(bf)

    # ---- fold weights into the transposed-GEMM layout (Cout on sublanes), bf16 operands.
    w1t = params["w1"].T.astype(bf)                                              # (Cout, Cin)
    w6c = jnp.transpose(params["w6"], (3, 0, 1, 2)).reshape(Cout, 9 * Cin).astype(bf)
    w12c = jnp.transpose(params["w12"], (3, 0, 1, 2)).reshape(Cout, 9 * Cin).astype(bf)
    p1 = params["wproj"][0 * Cout:1 * Cout].T.astype(bf)                         # (Cout, Cout)
    p6 = params["wproj"][1 * Cout:2 * Cout].T.astype(bf)
    p12 = params["wproj"][2 * Cout:3 * Cout].T.astype(bf)
    b1 = params["b1"].T.astype(jnp.float32)                                      # (Cout, 1)
    b6 = params["b6"].T.astype(jnp.float32)
    b12 = params["b12"].T.astype(jnp.float32)

    def full_spec(a):
        return pl.BlockSpec(a.shape, lambda n, nd=a.ndim: (0,) * nd)

    out_flat = pl.pallas_call(
        functools.partial(aspp_kernel, H=H, W=W, pad=pad, dilations=dilations),
        out_shape=jax.ShapeDtypeStruct((N, Cout, L), jnp.float32),
        grid_spec=pltpu.PrefetchScalarGridSpec(
            num_scalar_prefetch=0,
            grid=(N,),
            in_specs=[
                pl.BlockSpec((1, Cin, lin), lambda n: (n, 0, 0)),
                full_spec(w1t), full_spec(b1),
                full_spec(w6c), full_spec(b6),
                full_spec(w12c), full_spec(b12),
                full_spec(p1), full_spec(p6), full_spec(p12),
                pl.BlockSpec((1, Cout, 1), lambda n: (n, 0, 0)),
            ],
            out_specs=pl.BlockSpec((1, Cout, L), lambda n: (n, 0, 0)),
        ),
        compiler_params=pltpu.CompilerParams(dimension_semantics=("parallel",)),
    )(xpf, w1t, b1, w6c, b6, w12c, b12, p1, p6, p12, pbias)

    # drop the (Wp - W) garbage columns kept per row for lane-dense stores; already NCHW.
    return out_flat.reshape(N, Cout, H, Wp)[:, :, :, :W]


# ----------------------------------------------------------------- deterministic params ---
def make_convbnrelu(key, kshape, use_conv_bias=True, eps=1e-5):
    """Conv + eval-mode BatchNorm folded into (W_eff, b_eff). kshape = (..., Cin, Cout)."""
    k1, k2, k3, k4, k5, k6 = jax.random.split(key, 6)
    Cout = kshape[-1]
    w = jax.random.normal(k1, kshape, jnp.float32) * 0.1
    conv_b = (jax.random.normal(k2, (Cout,), jnp.float32) * 0.05
              if use_conv_bias else jnp.zeros((Cout,), jnp.float32))
    gamma = jax.random.uniform(k3, (Cout,), jnp.float32, minval=0.5, maxval=1.5)
    beta = jax.random.normal(k4, (Cout,), jnp.float32) * 0.1
    mean = jax.random.normal(k5, (Cout,), jnp.float32) * 0.1
    var = jax.random.uniform(k6, (Cout,), jnp.float32, minval=0.5, maxval=1.5)
    scale = gamma / jnp.sqrt(var + eps)
    w_eff = w * scale                       # scale broadcasts over the last (Cout) axis
    b_eff = (conv_b - mean) * scale + beta
    return w_eff, b_eff.reshape(1, Cout)


def make_params(key, cin, cout):
    ks = jax.random.split(key, 5)
    w1, b1 = make_convbnrelu(ks[0], (cin, cout))               # ratio 1  -> 1x1
    w6, b6 = make_convbnrelu(ks[1], (3, 3, cin, cout))         # ratio 6  -> 3x3 dil 6
    w12, b12 = make_convbnrelu(ks[2], (3, 3, cin, cout))       # ratio 12 -> 3x3 dil 12
    wp, bp = make_convbnrelu(ks[3], (cin, cout), use_conv_bias=False)   # image pooling
    wproj, bproj = make_convbnrelu(ks[4], (cout * 4, cout))    # final 1x1 on the concat
    return dict(w1=w1, b1=b1, w6=w6, b6=b6, w12=w12, b12=b12,
                wp=wp, bp=bp, wproj=wproj, bproj=bproj)


# -------------------------------------------------------------------- pure-JAX reference ---
def aspp_ref(x_nchw, params):
    """Pure-JAX NCHW reference.  MXU operands (x, conv weights) and per-branch outputs are
    rounded through bf16 to mirror the kernel's precision policy; accumulation is f32."""
    hi = jax.lax.Precision.HIGHEST
    q = lambda a: a.astype(jnp.bfloat16).astype(jnp.float32)
    x = jnp.transpose(x_nchw, (0, 2, 3, 1)).astype(jnp.float32)        # NHWC
    N, H, W, _ = x.shape
    Cout = params["w1"].shape[-1]
    xq = q(x)

    def conv1x1(inp, w, b):
        return jax.nn.relu(jnp.einsum('nhwc,cd->nhwd', inp, q(w), precision=hi) + b[0])

    def dil3x3(inp, w, b, d):
        xp = jnp.pad(inp, ((0, 0), (d, d), (d, d), (0, 0)))
        acc = 0.0
        for ky in range(3):
            for kx in range(3):
                acc = acc + jnp.einsum('nhwc,cd->nhwd',
                                       xp[:, d * ky:d * ky + H, d * kx:d * kx + W, :],
                                       q(w[ky, kx]), precision=hi)
        return jax.nn.relu(acc + b[0])

    y1 = q(conv1x1(xq, params["w1"], params["b1"]))
    y6 = q(dil3x3(xq, params["w6"], params["b6"], 6))
    y12 = q(dil3x3(xq, params["w12"], params["b12"], 12))

    m = jnp.mean(x, axis=(1, 2), keepdims=True)                        # exact f32 mean
    p = jax.nn.relu(jnp.einsum('nhwc,cd->nhwd', m, params["wp"], precision=hi)
                    + params["bp"][0])
    yp = jnp.broadcast_to(p, (N, H, W, Cout))                          # bilinear from 1x1

    cat = jnp.concatenate([y1, y6, y12, yp], axis=-1)
    wproj_q = jnp.concatenate(
        [q(params["wproj"][:3 * Cout]), params["wproj"][3 * Cout:]], axis=0)
    out = jax.nn.relu(jnp.einsum('nhwc,cd->nhwd', cat, wproj_q, precision=hi)
                      + params["bproj"][0])
    return jnp.transpose(out, (0, 3, 1, 2))


# ------------------------------------------------------------------------------- main ---
if __name__ == "__main__":
    key = jax.random.PRNGKey(0)
    k_x, k_p = jax.random.split(key)

    N, Cin, Cout, H, W = 2, 16, 16, 16, 16
    x = jax.random.normal(k_x, (N, Cin, H, W), jnp.float32)   # PyTorch-style NCHW input
    params = make_params(k_p, Cin, Cout)

    out = jax.jit(aspp_forward)(x, params)
    out = jax.block_until_ready(out)

    ref = aspp_ref(x, params)
    # tolerance reflects bf16 MXU operands (f32 accumulation) in the kernel
    np.testing.assert_allclose(np.asarray(out), np.asarray(ref), rtol=1e-2, atol=1e-2)
    assert out.shape == (N, Cout, H, W)

    print("KERNEL_OK")
</pallas_src>

<mosaic_0001>
module attributes {stable_mosaic.version = 11 : i64} {
  func.func @aspp_kernel(%arg0: i32, %arg1: memref<1x16x1664xbf16, #tpu.memory_space<vmem>>, %arg2: memref<16x16xbf16, #tpu.memory_space<vmem>>, %arg3: memref<16x1xf32, #tpu.memory_space<vmem>>, %arg4: memref<16x144xbf16, #tpu.memory_space<vmem>>, %arg5: memref<16x1xf32, #tpu.memory_space<vmem>>, %arg6: memref<16x144xbf16, #tpu.memory_space<vmem>>, %arg7: memref<16x1xf32, #tpu.memory_space<vmem>>, %arg8: memref<16x16xbf16, #tpu.memory_space<vmem>>, %arg9: memref<16x16xbf16, #tpu.memory_space<vmem>>, %arg10: memref<16x16xbf16, #tpu.memory_space<vmem>>, %arg11: memref<1x16x1xf32, #tpu.memory_space<vmem>>, %arg12: memref<1x16x640xf32, #tpu.memory_space<vmem>>) attributes {dimension_semantics = [#tpu.dimension_semantics<parallel>], iteration_bounds = array<i64: 2>, scalar_prefetch = 0 : i64, scratch_operands = 0 : i64, tpu.core_type = #tpu.core_type<tc>, window_params = [{transform_indices = @transform_0, window_bounds = array<i64: 1, 16, 1664>}, {pipeline_mode = #tpu.pipeline_mode<synchronous>, transform_indices = @transform_1, window_bounds = array<i64: 16, 16>}, {pipeline_mode = #tpu.pipeline_mode<synchronous>, transform_indices = @transform_2, window_bounds = array<i64: 16, 1>}, {pipeline_mode = #tpu.pipeline_mode<synchronous>, transform_indices = @transform_3, window_bounds = array<i64: 16, 144>}, {pipeline_mode = #tpu.pipeline_mode<synchronous>, transform_indices = @transform_4, window_bounds = array<i64: 16, 1>}, {pipeline_mode = #tpu.pipeline_mode<synchronous>, transform_indices = @transform_5, window_bounds = array<i64: 16, 144>}, {pipeline_mode = #tpu.pipeline_mode<synchronous>, transform_indices = @transform_6, window_bounds = array<i64: 16, 1>}, {pipeline_mode = #tpu.pipeline_mode<synchronous>, transform_indices = @transform_7, window_bounds = array<i64: 16, 16>}, {pipeline_mode = #tpu.pipeline_mode<synchronous>, transform_indices = @transform_8, window_bounds = array<i64: 16, 16>}, {pipeline_mode = #tpu.pipeline_mode<synchronous>, transform_indices = @transform_9, window_bounds = array<i64: 16, 16>}, {transform_indices = @transform_10, window_bounds = array<i64: 1, 16, 1>}, {transform_indices = @transform_11, window_bounds = array<i64: 1, 16, 640>}]} {
    %c0 = arith.constant 0 : index
    %c0_0 = arith.constant 0 : index
    %0 = vector.load %arg2[%c0, %c0_0] : memref<16x16xbf16, #tpu.memory_space<vmem>>, vector<16x16xbf16>
    %c0_1 = arith.constant 0 : index
    %c0_2 = arith.constant 0 : index
    %1 = vector.load %arg3[%c0_1, %c0_2] : memref<16x1xf32, #tpu.memory_space<vmem>>, vector<16x1xf32>
    %c0_3 = arith.constant 0 : index
    %c0_4 = arith.constant 0 : index
    %c492 = arith.constant 492 : index
    %2 = vector.load %arg1[%c0_3, %c0_4, %c492] : memref<1x16x1664xbf16, #tpu.memory_space<vmem>>, vector<1x16x640xbf16>
    %3 = vector.shape_cast %2 : vector<1x16x640xbf16> to vector<16x640xbf16>
    %cst = arith.constant dense<0.000000e+00> : vector<16x640xf32>
    %4 = tpu.matmul %0, %3, %cst {dimension_numbers = #tpu.dot_dimension_numbers<[1], [0], [0], [1], [0, 0, 1, 1], [], []>} : vector<16x16xbf16>, vector<16x640xbf16>, vector<16x640xf32> -> vector<16x640xf32>
    %5 = vector.broadcast %1 : vector<16x1xf32> to vector<16x640xf32>
    %6 = arith.addf %4, %5 : vector<16x640xf32>
    %cst_5 = arith.constant 0.000000e+00 : f32
    %7 = vector.broadcast %cst_5 : f32 to vector<16x640xf32>
    %8 = arith.maximumf %6, %7 : vector<16x640xf32>
    %9 = arith.truncf %8 : vector<16x640xf32> to vector<16x640xbf16>
    %c0_6 = arith.constant 0 : index
    %c0_7 = arith.constant 0 : index
    %10 = vector.load %arg4[%c0_6, %c0_7] : memref<16x144xbf16, #tpu.memory_space<vmem>>, vector<16x144xbf16>
    %c0_8 = arith.constant 0 : index
    %c0_9 = arith.constant 0 : index
    %11 = vector.load %arg5[%c0_8, %c0_9] : memref<16x1xf32, #tpu.memory_space<vmem>>, vector<16x1xf32>
    %c0_10 = arith.constant 0 : index
    %c0_11 = arith.constant 0 : index
    %c246 = arith.constant 246 : index
    %12 = vector.load %arg1[%c0_10, %c0_11, %c246] : memref<1x16x1664xbf16, #tpu.memory_space<vmem>>, vector<1x16x640xbf16>
    %13 = vector.shape_cast %12 : vector<1x16x640xbf16> to vector<16x640xbf16>
    %c0_12 = arith.constant 0 : index
    %c0_13 = arith.constant 0 : index
    %c252 = arith.constant 252 : index
    %14 = vector.load %arg1[%c0_12, %c0_13, %c252] : memref<1x16x1664xbf16, #tpu.memory_space<vmem>>, vector<1x16x640xbf16>
    %15 = vector.shape_cast %14 : vector<1x16x640xbf16> to vector<16x640xbf16>
    %c0_14 = arith.constant 0 : index
    %c0_15 = arith.constant 0 : index
    %c258 = arith.constant 258 : index
    %16 = vector.load %arg1[%c0_14, %c0_15, %c258] : memref<1x16x1664xbf16, #tpu.memory_space<vmem>>, vector<1x16x640xbf16>
    %17 = vector.shape_cast %16 : vector<1x16x640xbf16> to vector<16x640xbf16>
    %c0_16 = arith.constant 0 : index
    %c0_17 = arith.constant 0 : index
    %c486 = arith.constant 486 : index
    %18 = vector.load %arg1[%c0_16, %c0_17, %c486] : memref<1x16x1664xbf16, #tpu.memory_space<vmem>>, vector<1x16x640xbf16>
    %19 = vector.shape_cast %18 : vector<1x16x640xbf16> to vector<16x640xbf16>
    %c0_18 = arith.constant 0 : index
    %c0_19 = arith.constant 0 : index
    %c492_20 = arith.constant 492 : index
    %20 = vector.load %arg1[%c0_18, %c0_19, %c492_20] : memref<1x16x1664xbf16, #tpu.memory_space<vmem>>, vector<1x16x640xbf16>
    %21 = vector.shape_cast %20 : vector<1x16x640xbf16> to vector<16x640xbf16>
    %c0_21 = arith.constant 0 : index
    %c0_22 = arith.constant 0 : index
    %c498 = arith.constant 498 : index
    %22 = vector.load %arg1[%c0_21, %c0_22, %c498] : memref<1x16x1664xbf16, #tpu.memory_space<vmem>>, vector<1x16x640xbf16>
    %23 = vector.shape_cast %22 : vector<1x16x640xbf16> to vector<16x640xbf16>
    %c0_23 = arith.constant 0 : index
    %c0_24 = arith.constant 0 : index
    %c726 = arith.constant 726 : index
    %24 = vector.load %arg1[%c0_23, %c0_24, %c726] : memref<1x16x1664xbf16, #tpu.memory_space<vmem>>, vector<1x16x640xbf16>
    %25 = vector.shape_cast %24 : vector<1x16x640xbf16> to vector<16x640xbf16>
    %c0_25 = arith.constant 0 : index
    %c0_26 = arith.constant 0 : index
    %c732 = arith.constant 732 : index
    %26 = vector.load %arg1[%c0_25, %c0_26, %c732] : memref<1x16x1664xbf16, #tpu.memory_space<vmem>>, vector<1x16x640xbf16>
    %27 = vector.shape_cast %26 : vector<1x16x640xbf16> to vector<16x640xbf16>
    %c0_27 = arith.constant 0 : index
    %c0_28 = arith.constant 0 : index
    %c738 = arith.constant 738 : index
    %28 = vector.load %arg1[%c0_27, %c0_28, %c738] : memref<1x16x1664xbf16, #tpu.memory_space<vmem>>, vector<1x16x640xbf16>
    %29 = vector.shape_cast %28 : vector<1x16x640xbf16> to vector<16x640xbf16>
    %30 = tpu.concatenate %13, %15, %17, %19, %21, %23, %25, %27, %29 in 0 : vector<16x640xbf16>, vector<16x640xbf16>, vector<16x640xbf16>, vector<16x640xbf16>, vector<16x640xbf16>, vector<16x640xbf16>, vector<16x640xbf16>, vector<16x640xbf16>, vector<16x640xbf16> -> vector<144x640xbf16>
    %cst_29 = arith.constant dense<0.000000e+00> : vector<16x640xf32>
    %31 = tpu.matmul %10, %30, %cst_29 {dimension_numbers = #tpu.dot_dimension_numbers<[1], [0], [0], [1], [0, 0, 1, 1], [], []>} : vector<16x144xbf16>, vector<144x640xbf16>, vector<16x640xf32> -> vector<16x640xf32>
    %32 = vector.broadcast %11 : vector<16x1xf32> to vector<16x640xf32>
    %33 = arith.addf %31, %32 : vector<16x640xf32>
    %cst_30 = arith.constant 0.000000e+00 : f32
    %34 = vector.broadcast %cst_30 : f32 to vector<16x640xf32>
    %35 = arith.maximumf %33, %34 : vector<16x640xf32>
    %36 = arith.truncf %35 : vector<16x640xf32> to vector<16x640xbf16>
    %c0_31 = arith.constant 0 : index
    %c0_32 = arith.constant 0 : index
    %37 = vector.load %arg6[%c0_31, %c0_32] : memref<16x144xbf16, #tpu.memory_space<vmem>>, vector<16x144xbf16>
    %c0_33 = arith.constant 0 : index
    %c0_34 = arith.constant 0 : index
    %38 = vector.load %arg7[%c0_33, %c0_34] : memref<16x1xf32, #tpu.memory_space<vmem>>, vector<16x1xf32>
    %c0_35 = arith.constant 0 : index
    %c0_36 = arith.constant 0 : index
    %c0_37 = arith.constant 0 : index
    %39 = vector.load %arg1[%c0_35, %c0_36, %c0_37] : memref<1x16x1664xbf16, #tpu.memory_space<vmem>>, vector<1x16x640xbf16>
    %40 = vector.shape_cast %39 : vector<1x16x640xbf16> to vector<16x640xbf16>
    %c0_38 = arith.constant 0 : index
    %c0_39 = arith.constant 0 : index
    %c12 = arith.constant 12 : index
    %41 = vector.load %arg1[%c0_38, %c0_39, %c12] : memref<1x16x1664xbf16, #tpu.memory_space<vmem>>, vector<1x16x640xbf16>
    %42 = vector.shape_cast %41 : vector<1x16x640xbf16> to vector<16x640xbf16>
    %c0_40 = arith.constant 0 : index
    %c0_41 = arith.constant 0 : index
    %c24 = arith.constant 24 : index
    %43 = vector.load %arg1[%c0_40, %c0_41, %c24] : memref<1x16x1664xbf16, #tpu.memory_space<vmem>>, vector<1x16x640xbf16>
    %44 = vector.shape_cast %43 : vector<1x16x640xbf16> to vector<16x640xbf16>
    %c0_42 = arith.constant 0 : index
    %c0_43 = arith.constant 0 : index
    %c480 = arith.constant 480 : index
    %45 = vector.load %arg1[%c0_42, %c0_43, %c480] : memref<1x16x1664xbf16, #tpu.memory_space<vmem>>, vector<1x16x640xbf16>
    %46 = vector.shape_cast %45 : vector<1x16x640xbf16> to vector<16x640xbf16>
    %c0_44 = arith.constant 0 : index
    %c0_45 = arith.constant 0 : index
    %c492_46 = arith.constant 492 : index
    %47 = vector.load %arg1[%c0_44, %c0_45, %c492_46] : memref<1x16x1664xbf16, #tpu.memory_space<vmem>>, vector<1x16x640xbf16>
    %48 = vector.shape_cast %47 : vector<1x16x640xbf16> to vector<16x640xbf16>
    %c0_47 = arith.constant 0 : index
    %c0_48 = arith.constant 0 : index
    %c504 = arith.constant 504 : index
    %49 = vector.load %arg1[%c0_47, %c0_48, %c504] : memref<1x16x1664xbf16, #tpu.memory_space<vmem>>, vector<1x16x640xbf16>
    %50 = vector.shape_cast %49 : vector<1x16x640xbf16> to vector<16x640xbf16>
    %c0_49 = arith.constant 0 : index
    %c0_50 = arith.constant 0 : index
    %c960 = arith.constant 960 : index
    %51 = vector.load %arg1[%c0_49, %c0_50, %c960] : memref<1x16x1664xbf16, #tpu.memory_space<vmem>>, vector<1x16x640xbf16>
    %52 = vector.shape_cast %51 : vector<1x16x640xbf16> to vector<16x640xbf16>
    %c0_51 = arith.constant 0 : index
    %c0_52 = arith.constant 0 : index
    %c972 = arith.constant 972 : index
    %53 = vector.load %arg1[%c0_51, %c0_52, %c972] : memref<1x16x1664xbf16, #tpu.memory_space<vmem>>, vector<1x16x640xbf16>
    %54 = vector.shape_cast %53 : vector<1x16x640xbf16> to vector<16x640xbf16>
    %c0_53 = arith.constant 0 : index
    %c0_54 = arith.constant 0 : index
    %c984 = arith.constant 984 : index
    %55 = vector.load %arg1[%c0_53, %c0_54, %c984] : memref<1x16x1664xbf16, #tpu.memory_space<vmem>>, vector<1x16x640xbf16>
    %56 = vector.shape_cast %55 : vector<1x16x640xbf16> to vector<16x640xbf16>
    %57 = tpu.concatenate %40, %42, %44, %46, %48, %50, %52, %54, %56 in 0 : vector<16x640xbf16>, vector<16x640xbf16>, vector<16x640xbf16>, vector<16x640xbf16>, vector<16x640xbf16>, vector<16x640xbf16>, vector<16x640xbf16>, vector<16x640xbf16>, vector<16x640xbf16> -> vector<144x640xbf16>
    %cst_55 = arith.constant dense<0.000000e+00> : vector<16x640xf32>
    %58 = tpu.matmul %37, %57, %cst_55 {dimension_numbers = #tpu.dot_dimension_numbers<[1], [0], [0], [1], [0, 0, 1, 1], [], []>} : vector<16x144xbf16>, vector<144x640xbf16>, vector<16x640xf32> -> vector<16x640xf32>
    %59 = vector.broadcast %38 : vector<16x1xf32> to vector<16x640xf32>
    %60 = arith.addf %58, %59 : vector<16x640xf32>
    %cst_56 = arith.constant 0.000000e+00 : f32
    %61 = vector.broadcast %cst_56 : f32 to vector<16x640xf32>
    %62 = arith.maximumf %60, %61 : vector<16x640xf32>
    %63 = arith.truncf %62 : vector<16x640xf32> to vector<16x640xbf16>
    %c0_57 = arith.constant 0 : index
    %c0_58 = arith.constant 0 : index
    %c0_59 = arith.constant 0 : index
    %64 = vector.load %arg11[%c0_57, %c0_58, %c0_59] : memref<1x16x1xf32, #tpu.memory_space<vmem>>, vector<1x16x1xf32>
    %65 = vector.shape_cast %64 : vector<1x16x1xf32> to vector<16x1xf32>
    %c0_60 = arith.constant 0 : index
    %c0_61 = arith.constant 0 : index
    %66 = vector.load %arg8[%c0_60, %c0_61] : memref<16x16xbf16, #tpu.memory_space<vmem>>, vector<16x16xbf16>
    %cst_62 = arith.constant dense<0.000000e+00> : vector<16x640xf32>
    %67 = tpu.matmul %66, %9, %cst_62 {dimension_numbers = #tpu.dot_dimension_numbers<[1], [0], [0], [1], [0, 0, 1, 1], [], []>} : vector<16x16xbf16>, vector<16x640xbf16>, vector<16x640xf32> -> vector<16x640xf32>
    %68 = vector.broadcast %65 : vector<16x1xf32> to vector<16x640xf32>
    %69 = arith.addf %68, %67 : vector<16x640xf32>
    %c0_63 = arith.constant 0 : index
    %c0_64 = arith.constant 0 : index
    %70 = vector.load %arg9[%c0_63, %c0_64] : memref<16x16xbf16, #tpu.memory_space<vmem>>, vector<16x16xbf16>
    %cst_65 = arith.constant dense<0.000000e+00> : vector<16x640xf32>
    %71 = tpu.matmul %70, %36, %cst_65 {dimension_numbers = #tpu.dot_dimension_numbers<[1], [0], [0], [1], [0, 0, 1, 1], [], []>} : vector<16x16xbf16>, vector<16x640xbf16>, vector<16x640xf32> -> vector<16x640xf32>
    %72 = arith.addf %69, %71 : vector<16x640xf32>
    %c0_66 = arith.constant 0 : index
    %c0_67 = arith.constant 0 : index
    %73 = vector.load %arg10[%c0_66, %c0_67] : memref<16x16xbf16, #tpu.memory_space<vmem>>, vector<16x16xbf16>
    %cst_68 = arith.constant dense<0.000000e+00> : vector<16x640xf32>
    %74 = tpu.matmul %73, %63, %cst_68 {dimension_numbers = #tpu.dot_dimension_numbers<[1], [0], [0], [1], [0, 0, 1, 1], [], []>} : vector<16x16xbf16>, vector<16x640xbf16>, vector<16x640xf32> -> vector<16x640xf32>
    %75 = arith.addf %72, %74 : vector<16x640xf32>
    %cst_69 = arith.constant 0.000000e+00 : f32
    %76 = vector.broadcast %cst_69 : f32 to vector<16x640xf32>
    %77 = arith.maximumf %75, %76 : vector<16x640xf32>
    %c0_70 = arith.constant 0 : index
    %c0_71 = arith.constant 0 : index
    %c0_72 = arith.constant 0 : index
    %78 = vector.load %arg12[%c0_70, %c0_71, %c0_72] : memref<1x16x640xf32, #tpu.memory_space<vmem>>, vector<1x16x640xf32>
    %79 = vector.shape_cast %78 : vector<1x16x640xf32> to vector<16x640xf32>
    %80 = vector.shape_cast %77 : vector<16x640xf32> to vector<1x16x640xf32>
    tpu.vector_store %arg12[%c0_70, %c0_71, %c0_72], %80 {strides = array<i32>} : memref<1x16x640xf32, #tpu.memory_space<vmem>>, vector<1x16x640xf32>,
    return
  }
  func.func @transform_0(%arg0: i32) -> (i32, i32, i32) {
    %c0_i32 = arith.constant 0 : i32
    %c0_i32_0 = arith.constant 0 : i32
    %c0_i32_1 = arith.constant 0 : i32
    return %arg0, %c0_i32, %c0_i32_0 : i32, i32, i32
  }
  func.func @transform_1(%arg0: i32) -> (i32, i32) {
    %c0_i32 = arith.constant 0 : i32
    %c0_i32_0 = arith.constant 0 : i32
    %c0_i32_1 = arith.constant 0 : i32
    return %c0_i32, %c0_i32_0 : i32, i32
  }
  func.func @transform_2(%arg0: i32) -> (i32, i32) {
    %c0_i32 = arith.constant 0 : i32
    %c0_i32_0 = arith.constant 0 : i32
    %c0_i32_1 = arith.constant 0 : i32
    return %c0_i32, %c0_i32_0 : i32, i32
  }
  func.func @transform_3(%arg0: i32) -> (i32, i32) {
    %c0_i32 = arith.constant 0 : i32
    %c0_i32_0 = arith.constant 0 : i32
    %c0_i32_1 = arith.constant 0 : i32
    return %c0_i32, %c0_i32_0 : i32, i32
  }
  func.func @transform_4(%arg0: i32) -> (i32, i32) {
    %c0_i32 = arith.constant 0 : i32
    %c0_i32_0 = arith.constant 0 : i32
    %c0_i32_1 = arith.constant 0 : i32
    return %c0_i32, %c0_i32_0 : i32, i32
  }
  func.func @transform_5(%arg0: i32) -> (i32, i32) {
    %c0_i32 = arith.constant 0 : i32
    %c0_i32_0 = arith.constant 0 : i32
    %c0_i32_1 = arith.constant 0 : i32
    return %c0_i32, %c0_i32_0 : i32, i32
  }
  func.func @transform_6(%arg0: i32) -> (i32, i32) {
    %c0_i32 = arith.constant 0 : i32
    %c0_i32_0 = arith.constant 0 : i32
    %c0_i32_1 = arith.constant 0 : i32
    return %c0_i32, %c0_i32_0 : i32, i32
  }
  func.func @transform_7(%arg0: i32) -> (i32, i32) {
    %c0_i32 = arith.constant 0 : i32
    %c0_i32_0 = arith.constant 0 : i32
    %c0_i32_1 = arith.constant 0 : i32
    return %c0_i32, %c0_i32_0 : i32, i32
  }
  func.func @transform_8(%arg0: i32) -> (i32, i32) {
    %c0_i32 = arith.constant 0 : i32
    %c0_i32_0 = arith.constant 0 : i32
    %c0_i32_1 = arith.constant 0 : i32
    return %c0_i32, %c0_i32_0 : i32, i32
  }
  func.func @transform_9(%arg0: i32) -> (i32, i32) {
    %c0_i32 = arith.constant 0 : i32
    %c0_i32_0 = arith.constant 0 : i32
    %c0_i32_1 = arith.constant 0 : i32
    return %c0_i32, %c0_i32_0 : i32, i32
  }
  func.func @transform_10(%arg0: i32) -> (i32, i32, i32) {
    %c0_i32 = arith.constant 0 : i32
    %c0_i32_0 = arith.constant 0 : i32
    %c0_i32_1 = arith.constant 0 : i32
    return %arg0, %c0_i32, %c0_i32_0 : i32, i32, i32
  }
  func.func @transform_11(%arg0: i32) -> (i32, i32, i32) {
    %c0_i32 = arith.constant 0 : i32
    %c0_i32_0 = arith.constant 0 : i32
    %c0_i32_1 = arith.constant 0 : i32
    return %arg0, %c0_i32, %c0_i32_0 : i32, i32, i32
  }
}

</mosaic_0001>

<bundles_post_ra>
// kernel: aspp_forward.1
= control target key start
LH: loop header
LB: loop body
LE: loop exit
PB: predicated region body
PF: predicated region fallthrough
CT: control target
= control target key end

     0   :  { %s2318_s17 = smov 0   ;;  %s3251_s0 = inlined_call_operand.vmem [shape: bf16[2,16,1664], index: 0, kind: input, shape index: {}]   ;;  %s3252_s1 = inlined_call_operand.vmem [shape: bf16[16,16], index: 1, kind: input, shape index: {}]   ;;  %s3253_s2 = inlined_call_operand.vmem [shape: f32[16,1], index: 2, kind: input, shape index: {}]   ;;  %s3254_s3 = inlined_call_operand.vmem [shape: bf16[16,144], index: 3, kind: input, shape index: {}]   ;;  %s3255_s4 = inlined_call_operand.vmem [shape: f32[16,1], index: 4, kind: input, shape index: {}]   ;;  %s3256_s5 = inlined_call_operand.vmem [shape: bf16[16,144], index: 5, kind: input, shape index: {}]   ;;  %s3257_s6 = inlined_call_operand.vmem [shape: f32[16,1], index: 6, kind: input, shape index: {}]   ;;  %s3258_s7 = inlined_call_operand.vmem [shape: bf16[16,16], index: 7, kind: input, shape index: {}]   ;;  %s3259_s8 = inlined_call_operand.vmem [shape: bf16[16,16], index: 8, kind: input, shape index: {}]   ;;  %s3260_s9 = inlined_call_operand.vmem [shape: bf16[16,16], index: 9, kind: input, shape index: {}]   ;;  %s3261_s10 = inlined_call_operand.vmem [shape: f32[2,16,1], index: 10, kind: input, shape index: {}]   ;;  %s3262_s11 = inlined_call_operand.vmem [shape: f32[2,16,640], index: 11, kind: output, shape index: {}]  }
   0x1 LB: > { %s1952_s18 = sadd.s32 4294967295, %s2242_s17   ;;  %p1956_p0 = scmp.ge.s32.totalorder %s2242_s17, 1  ;;  %s2242_s17 = sphi %s2318_s17, %s21_s17  }
   0x2   : > { %p347_p1 = scmp.lt.s32.totalorder %s2242_s17, 3 }
   0x4   : > { %p348_p2 = pnand %p1956_p0, %p347_p1 }
   0x5   : > { %p392_p3 = scmp.lt.s32.totalorder (!%p348_p2), %s1952_s18, 1  ;;  %s2245_s27 = smov (!%p348_p2), 20  }
   0x6   : > { %351 = sbr.rel (%p348_p2) target bundleno = 859 (0x35b), region = 64  ;;  %s2246_s28 = smov (!%p348_p2), 122  }
   0x7   : > { %s2247_s29 = smov (!%p348_p2), 26   ;;  %s2248_s30 = smov (!%p348_p2), 32  }
   0x8   : > { %s2249_s12 = smov (!%p348_p2), 4   ;;  %s2250_s13 = smov (!%p348_p2), 10  }
   0x9   : > { %s2251_s14 = smov (!%p348_p2), 16   ;;  %s2252_s15 = smov (!%p348_p2), 116  }
   0xa   : > { %s2253_s20 = smov (!%p348_p2), 52   ;;  %s2255_s22 = smov (!%p348_p2), 8  }
   0xb   : > { %v410_v0 = vld [vmem:[%s3253_s2] sm:$0xff]  ;;  %v2244_v1 = vmov 0   ;;  %s3264_s18 = smov (!%p392_p3, %s1952_s18), 1  ;;  %v411_v2 = vld [vmem:[%s3253_s2 + $0x8] sm:$0xff]  ;;  %vm469_vm0 = vcmask 162816   ;;  %vm480_vm1 = vcmask 130048  }
   0xc   : > { %2233 = vset.pattern.permute.xlu0 %v2244_v1  ;;  %2234 = vset.pattern.permute.xlu2 %v2244_v1  ;;  %s2209_s21 = smul.u32 104, %s3264_s18  ;;  %v2166_v62 = vld [vmem:[%s3252_s1] sm:$0xff]  ;;  %vm773_vm2 = vcmask 211968   ;;  %vm755_vm3 = vcmask 261120   ;;  %vm721_vm4 = vcmask 31744   ;;  %vm703_vm5 = vcmask 80896  }
   0xd   : > { %420 = vperm.xlu0 %2233, %v410_v0   ;;  %2235 = vset.pattern.permute.xlu1 %v2244_v1  ;;  %vm667_vm6 = vcmask 949248   ;;  %vm625_vm7 = vcmask 998400   ;;  %s2256_s23 = smov 104   ;;  %vm1372_vm8 = vcmask 424960   ;;  %vm1349_vm9 = vcmask 523264  }
   0xe   : > { %s2338_s26 = scalar_lea.vmem %s3251_s0, %s2209_s21  ;;  %s2254_s21 = smov 64   ;;  %vm1302_vm10 = vcmask 64512   ;;  %vm1257_vm11 = vcmask 850944   ;;  %vm1395_vm12 = vcmask 326656  }
   0xf   : > { %v1975_v3 = vld [vmem:[%s2338_s26 + $0x14] sm:$0xf]  ;;  %v2171_v4 = vld [vmem:[%s2338_s26 + $0x44] sm:$0xf0]  ;;  %v1967_v5 = vld [vmem:[%s2338_s26 + $0xc] sm:$0xf] }
  0x10   : > { %v2343_v6 = vor.u32 %v2171_v4, %v1975_v3  ;;  %v2170_v7 = vld [vmem:[%s2338_s26 + $0x3c] sm:$0xf0]  ;;  %v1983_v9 = vld [vmem:[%s2338_s26 + $0x1c] sm:$0xf]  ;;  %v2172_v10 = vld [vmem:[%s2338_s26 + $0x4c] sm:$0xf0] }
  0x11   : > { %v2346_v8 = vor.u32 %v2170_v7, %v1967_v5  ;;  %v2168_v11 = vld [vmem:[%s2338_s26 + $0x18] sm:$0xf]  ;;  %v1977_v12 = vld [vmem:[%s2338_s26 + $0x48] sm:$0xf0]  ;;  %v2167_v13 = vld [vmem:[%s2338_s26 + $0x10] sm:$0xf]  ;;  %v2358_v15 = vor.u32 %v2172_v10, %v1983_v9 }
  0x12   : > { %461 = vrot.lane.b32.xlu2 %v2343_v6, %s2245_s27  ;;  %v1969_v14 = vld [vmem:[%s2338_s26 + $0x40] sm:$0xf0]  ;;  %v2360_v16 = vor.u32 %v2168_v11, %v1977_v12  ;;  %v2175_v18 = vld [vmem:[%s2338_s26 + $0x8] sm:$0xf]  ;;  %v1998_v19 = vld [vmem:[%s2338_s26 + $0x38] sm:$0xf0] }
  0x13   : > { %457 = vrot.lane.b32.xlu1 %v2346_v8, %s2245_s27  ;;  %v2362_v17 = vor.u32 %v2167_v13, %v1969_v14  ;;  %v1996_v20 = vld [vmem:[%s2338_s26 + $0x4] sm:$0xf]  ;;  %v2178_v21 = vld [vmem:[%s2338_s26 + $0x34] sm:$0xf0]  ;;  %v2169_v22 = vld [vmem:[%s2338_s26 + $0x20] sm:$0xf]  ;;  %v2376_v24 = vor.u32 %v2175_v18, %v1998_v19 }
  0x14   : > { %v1985_v23 = vld [vmem:[%s2338_s26 + $0x50] sm:$0xf0]  ;;  %v2378_v25 = vor.u32 %v2178_v21, %v1996_v20  ;;  %v2044_v27 = vld [vmem:[%s2338_s26 + $0x1c] sm:$0xf]  ;;  %v2189_v28 = vld [vmem:[%s2338_s26 + $0x4c] sm:$0xf0] }
  0x15   : > { %425 = vperm.xlu0 %2233, %v411_v2   ;;  %v2380_v26 = vor.u32 %v2169_v22, %v1985_v23  ;;  %v2177_v29 = vld [vmem:[%s2338_s26 + $0x18] sm:$0xf]  ;;  %v2014_v30 = vld [vmem:[%s2338_s26 + $0x48] sm:$0xf0]  ;;  %v2012_v31 = vld [vmem:[%s2338_s26 + $0x14] sm:$0xf]  ;;  %v2394_v33 = vor.u32 %v2189_v28, %v2044_v27 }
  0x16   : > { %v2180_v32 = vld [vmem:[%s2338_s26 + $0x44] sm:$0xf0]  ;;  %v2396_v34 = vor.u32 %v2177_v29, %v2014_v30  ;;  %v2181_v36 = vld [vmem:[%s2338_s26 + $0xc] sm:$0xf]  ;;  %v2022_v37 = vld [vmem:[%s2338_s26 + $0x3c] sm:$0xf0] }
  0x17   : > { %v2398_v35 = vor.u32 %v2180_v32, %v2012_v31  ;;  %v2020_v38 = vld [vmem:[%s2338_s26 + $0x8] sm:$0xf]  ;;  %v2184_v39 = vld [vmem:[%s2338_s26 + $0x38] sm:$0xf0]  ;;  %v2187_v40 = vld [vmem:[%s2338_s26 + $0x20] sm:$0xf]  ;;  %v2025_v42 = vor.u32 %v2181_v36, %v2022_v37 }
  0x18   : > { %v2046_v41 = vld [vmem:[%s2338_s26 + $0x50] sm:$0xf0]  ;;  %v2021_v43 = vor.u32 %v2184_v39, %v2020_v38  ;;  %v2004_v45 = vld [vmem:[%s2338_s26 + $0xc] sm:$0xf]  ;;  %v2179_v46 = vld [vmem:[%s2338_s26 + $0x3c] sm:$0xf0] }
  0x19   : > { %v2436_v44 = vor.u32 %v2187_v40, %v2046_v41  ;;  %v2028_v47 = vld [vmem:[%s2338_s26 + $0x10] sm:$0xf]  ;;  %v2185_v48 = vld [vmem:[%s2338_s26 + $0x40] sm:$0xf0]  ;;  %v2446_v49 = vor.u32 %v2179_v46, %v2004_v45  ;;  %v2190_v52 = vld [vmem:[%s2338_s26 + $0x54] sm:$0xf0] }
  0x1a   : > { %463 = vrot.lane.b32.xlu2 %v2360_v16, %s2245_s27  ;;  %v2029_v50 = vor.u32 %v2185_v48, %v2028_v47  ;;  %v2052_v51 = vld [vmem:[%s2338_s26 + $0x24] sm:$0xf]  ;;  %v2176_v53 = vld [vmem:[%s2338_s26 + $0x10] sm:$0xf]  ;;  %v2182_v58 = vld [vmem:[%s2338_s26 + $0x14] sm:$0xf] }
  0x1b   : > { %459 = vrot.lane.b32.xlu1 %v2362_v17, %s2245_s27  ;;  %v2006_v54 = vld [vmem:[%s2338_s26 + $0x40] sm:$0xf0]  ;;  %v2457_v55 = vor.u32 %v2190_v52, %v2052_v51  ;;  %v2030_v59 = vld [vmem:[%s2338_s26 + $0x44] sm:$0xf0]  ;;  %v2054_v3 = vld [vmem:[%s2338_s26 + $0x58] sm:$0xf0] }
  0x1c   : > { %v2459_v56 = vor.u32 %v2176_v53, %v2006_v54  ;;  %v2033_v63 = vor.u32 %v2182_v58, %v2030_v59  ;;  %v2188_v2 = vld [vmem:[%s2338_s26 + $0x28] sm:$0xf]  ;;  %v2036_v31 = vld [vmem:[%s2338_s26 + $0x18] sm:$0xf]  ;;  %v2186_v32 = vld [vmem:[%s2338_s26 + $0x48] sm:$0xf0] }
  0x1d   : > { %465 = vrot.lane.b32.xlu0 %v2358_v15, %s2245_s27  ;;  %v2500_v4 = vor.u32 %v2188_v2, %v2054_v3 }
  0x22   : > { %613 = vrot.lane.b32.xlu2 %v2378_v25, %s2246_s28 }
  0x23   : > { %467 = vrot.lane.b32.xlu1 %v2380_v26, %s2245_s27 }
  0x25   : > { %615 = vrot.lane.b32.xlu0 %v2376_v24, %s2246_s28 }
  0x2a   : > { %763 = vrot.lane.b32.xlu2 %v2396_v34, %s2247_s29 }
  0x2b   : > { %761 = vrot.lane.b32.xlu1 %v2398_v35, %s2247_s29 }
  0x2d   : > { %765 = vrot.lane.b32.xlu0 %v2394_v33, %s2247_s29 }
  0x32   : > { %745 = vrot.lane.b32.xlu2 %v2396_v34, %s2248_s30 }
  0x33   : > { %743 = vrot.lane.b32.xlu1 %v2398_v35, %s2248_s30 }
  0x35   : > { %747 = vrot.lane.b32.xlu0 %v2394_v33, %s2248_s30 }
  0x3a   : > { %711 = vrot.lane.b32.xlu2 %v2362_v17, %s2249_s12 }
  0x3b   : > { %709 = vrot.lane.b32.xlu1 %v2346_v8, %s2249_s12 }
  0x3d   : > { %713 = vrot.lane.b32.xlu0 %v2343_v6, %s2249_s12 }
  0x42   : > { %693 = vrot.lane.b32.xlu2 %v2362_v17, %s2250_s13 }
  0x43   : > { %691 = vrot.lane.b32.xlu1 %v2346_v8, %s2250_s13 }
  0x45   : > { %695 = vrot.lane.b32.xlu0 %v2343_v6, %s2250_s13 }
  0x4a   : > { %675 = vrot.lane.b32.xlu2 %v2362_v17, %s2251_s14 }
  0x4b   : > { %673 = vrot.lane.b32.xlu1 %v2346_v8, %s2251_s14 }
  0x4d   : > { %677 = vrot.lane.b32.xlu0 %v2343_v6, %s2251_s14 }
  0x52   : > { %655 = vrot.lane.b32.xlu2 %v2021_v43, %s2252_s15 }
  0x53   : > { %767 = vrot.lane.b32.xlu1 %v2436_v44, %s2247_s29 }
  0x55   : > { %657 = vrot.lane.b32.xlu0 %v2025_v42, %s2252_s15 }
  0x5a   : > { %749 = vrot.lane.b32.xlu2 %v2436_v44, %s2248_s30 }
  0x5b   : > { %659 = vrot.lane.b32.xlu1 %v2029_v50, %s2252_s15 }
  0x5d   : > { %617 = vrot.lane.b32.xlu0 %v2446_v49, %s2246_s28 }
  0x62   : > { %769 = vrot.lane.b32.xlu2 %v2457_v55, %s2247_s29 }
  0x63   : > { %619 = vrot.lane.b32.xlu1 %v2459_v56, %s2246_s28 }
  0x65   : > { %715 = vrot.lane.b32.xlu0 %v2360_v16, %s2249_s12 }
  0x6a   : > { %697 = vrot.lane.b32.xlu2 %v2360_v16, %s2250_s13 }
  0x6b   : > { %751 = vrot.lane.b32.xlu1 %v2457_v55, %s2248_s30 }
  0x6c   : > { %v462_v57 = vpop.permute.xlu2 %461 }
  0x6d   : > { %779 = vrot.lane.b32.xlu0 %v2398_v35, %s2245_s27 }
  0x72   : > { %717 = vrot.lane.b32.xlu2 %v2358_v15, %s2249_s12 }
  0x73   : > { %781 = vrot.lane.b32.xlu1 %v2396_v34, %s2245_s27 }
  0x74   : > { %v464_v60 = vpop.permute.xlu2 %463 }
  0x75   : > { %679 = vrot.lane.b32.xlu0 %v2360_v16, %s2251_s14  ;;  %v2482_v61 = vsel %vm469_vm0, %v462_v57, %v464_v60 }
  0x76   : > { %519 = vmatpush.bf16.msra.mxu2 %v2482_v61 }
  0x79   : > { %1991 = vmatmul.msk.bf16.vlgmr.msra.gmra.mxu2 %vm480_vm1, %v2166_v62 }
  0x7a   : > { %699 = vrot.lane.b32.xlu2 %v2358_v15, %s2250_s13 }
  0x7b   : > { %783 = vrot.lane.b32.xlu1 %v2394_v33, %s2245_s27  ;;  %v2037_v33 = vor.u32 %v2186_v32, %v2036_v31 }
  0x7c   : > { %v2496_v1 = vpop.permute.xlu2 %613 }
  0x7d   : > { %661 = vrot.lane.b32.xlu0 %v2033_v63, %s2252_s15  ;;  %v2038_v63 = vld [vmem:[%s2338_s26 + $0x4c] sm:$0xf0] }
  0x7f   : > { %v2494_v0 = vpop.permute.xlu0 %420 }
  0x82   : > { %681 = vrot.lane.b32.xlu2 %v2358_v15, %s2251_s14 }
  0x83   : > { %771 = vrot.lane.b32.xlu1 %v2500_v4, %s2247_s29  ;;  %s2257_s29 = smov 40  }
  0x84   : > { %v764_v7 = vpop.permute.xlu2 %763 }
  0x85   : > { %v458_v9 = vpop.permute.xlu1 %457 }
  0x87   : > { %v2506_v5 = vpop.permute.xlu0 %425 }
  0x8a   : > { %621 = vrot.lane.b32.xlu2 %v2398_v35, %s2246_s28 }
  0x8c   : > { %v746_v11 = vpop.permute.xlu2 %745 }
  0x8d   : > { %v460_v12 = vpop.permute.xlu1 %459 }
  0x8e   : > { %v2515_v14 = vsel %vm469_vm0, %v458_v9, %v460_v12  ;;  %v2518_v18 = vsel %vm469_vm0, %v460_v12, %v462_v57 }
  0x8f   : > { %v466_v10 = vpop.permute.xlu0 %465  ;;  %491 = vmatpush.bf16.msra.mxu0 %v2515_v14  ;;  %505 = vmatpush.bf16.msra.mxu1 %v2518_v18 }
  0x90   : > { %v2511_v13 = vsel %vm469_vm0, %v464_v60, %v466_v10 }
  0x91   : > { %533 = vmatpush.bf16.msra.mxu3 %v2511_v13 }
  0x92   : > { %1989 = vmatmul.msk.bf16.vlgmr.msra.gmra.mxu0 %vm480_vm1, %v2166_v62  ;;  %1990 = vmatmul.msk.bf16.vlgmr.msra.gmra.mxu1 %vm480_vm1, %v2166_v62 }
  0x93   : > { %785 = vrot.lane.b32.xlu2 %v2436_v44, %s2245_s27 }
  0x94   : > { %1992 = vmatmul.msk.bf16.vlgmr.msra.gmra.mxu3 %vm480_vm1, %v2166_v62  ;;  %v712_v20 = vpop.permute.xlu2 %711 }
  0x95   : > { %v468_v21 = vpop.permute.xlu1 %467 }
  0x96   : > { %v2530_v22 = vsel %vm469_vm0, %v466_v10, %v468_v21 }
  0x97   : > { %v2527_v19 = vpop.permute.xlu0 %615  ;;  %547 = vmatpush.bf16.msrb.mxu0 %v2530_v22 }
  0x9c   : > { %v694_v27 = vpop.permute.xlu2 %693 }
  0x9d   : > { %v762_v28 = vpop.permute.xlu1 %761 }
  0x9e   : > { %v774_v30 = vsel %vm773_vm2, %v762_v28, %v764_v7 }
  0x9f   : > { %v766_v23 = vpop.permute.xlu0 %765  ;;  %901 = vrot.lane.b32.xlu0 %v774_v30, %s2250_s13 }
  0xa0   : > { %v775_v29 = vsel %vm773_vm2, %v764_v7, %v766_v23 }
  0xa1   : > { %903 = vrot.lane.b32.xlu1 %v775_v29, %s2250_s13 }
  0xa2   : > { %1993 = vmatmul.msk.bf16.vlgmr.msrb.gmra.mxu0 %vm480_vm1, %v2166_v62  ;;  %v2183_v62 = vld [vmem:[%s2338_s26 + $0x1c] sm:$0xf] }
  0xa3   : > { %v2041_v7 = vor.u32 %v2183_v62, %v2038_v63 }
  0xa4   : > { %v676_v37 = vpop.permute.xlu2 %675 }
  0xa5   : > { %v744_v38 = vpop.permute.xlu1 %743 }
  0xa6   : > { %v756_v40 = vsel %vm755_vm3, %v744_v38, %v746_v11 }
  0xa7   : > { %v2540_v36 = vpop.permute.xlu0 %747  ;;  %753 = vrot.lane.b32.xlu0 %v2500_v4, %s2248_s30 }
  0xa8   : > { %v757_v39 = vsel %vm755_vm3, %v746_v11, %v2540_v36 }
  0xa9   : > { %891 = vrot.lane.b32.xlu2 %v757_v39, %s2250_s13  ;;  %663 = vrot.lane.b32.xlu1 %v2037_v33, %s2252_s15 }
  0xac   : > { %v2549_v41 = vpop.permute.xlu2 %655 }
  0xad   : > { %v710_v42 = vpop.permute.xlu1 %709 }
  0xae   : > { %v722_v43 = vsel %vm721_vm4, %v710_v42, %v712_v20 }
  0xaf   : > { %v2553_v44 = vpop.permute.xlu0 %713  ;;  %787 = vrot.lane.b32.xlu0 %v2457_v55, %s2245_s27 }
  0xb0   : > { %v723_v48 = vsel %vm721_vm4, %v712_v20, %v2553_v44 }
  0xb1   : > { %889 = vrot.lane.b32.xlu1 %v756_v40, %s2250_s13  ;;  %877 = vrot.lane.b32.xlu2 %v722_v43, %s2250_s13 }
  0xb4   : > { %v2558_v45 = vpop.permute.xlu2 %749 }
  0xb5   : > { %v692_v46 = vpop.permute.xlu1 %691 }
  0xb6   : > { %v704_v55 = vsel %vm703_vm5, %v692_v46, %v694_v27 }
  0xb7   : > { %719 = vrot.lane.b32.xlu0 %v2380_v26, %s2249_s12  ;;  %v696_v47 = vpop.permute.xlu0 %695 }
  0xb8   : > { %v705_v53 = vsel %vm703_vm5, %v694_v27, %v696_v47 }
  0xb9   : > { %623 = vrot.lane.b32.xlu1 %v2396_v34, %s2246_s28  ;;  %701 = vrot.lane.b32.xlu2 %v2380_v26, %s2250_s13 }
  0xbc   : > { %v2568_v50 = vpop.permute.xlu2 %769 }
  0xbd   : > { %v674_v51 = vpop.permute.xlu1 %673 }
  0xbe   : > { %v686_v59 = vsel %vm480_vm1, %v674_v51, %v676_v37 }
  0xbf   : > { %879 = vrot.lane.b32.xlu0 %v723_v48, %s2250_s13  ;;  %v2573_v52 = vpop.permute.xlu0 %677 }
  0xc0   : > { %v687_v54 = vsel %vm480_vm1, %v676_v37, %v2573_v52 }
  0xc1   : > { %899 = vrot.lane.b32.xlu1 %v762_v28, %s2250_s13  ;;  %887 = vrot.lane.b32.xlu2 %v744_v38, %s2250_s13  ;;  %v758_v28 = vsel %vm755_vm3, %v2540_v36, %v2558_v45 }
  0xc4   : > { %v2582_v57 = vpop.permute.xlu2 %697 }
  0xc5   : > { %v768_v58 = vpop.permute.xlu1 %767  ;;  %v706_v37 = vsel %vm703_vm5, %v696_v47, %v2582_v57 }
  0xc6   : > { %v776_v60 = vsel %vm773_vm2, %v766_v23, %v768_v58  ;;  %v777_v29 = vsel %vm773_vm2, %v768_v58, %v2568_v50 }
  0xc7   : > { %865 = vrot.lane.b32.xlu0 %v704_v55, %s2250_s13  ;;  %v658_v3 = vpop.permute.xlu0 %657 }
  0xc8   : > { %v668_v20 = vsel %vm667_vm6, %v2549_v41, %v658_v3 }
  0xc9   : > { %867 = vrot.lane.b32.xlu1 %v705_v53, %s2250_s13  ;;  %855 = vrot.lane.b32.xlu2 %v687_v54, %s2250_s13 }
  0xcc   : > { %v2592_v2 = vpop.permute.xlu2 %717 }
  0xcd   : > { %v2594_v9 = vpop.permute.xlu1 %659 }
  0xce   : > { %v669_v12 = vsel %vm667_vm6, %v658_v3, %v2594_v9 }
  0xcf   : > { %683 = vrot.lane.b32.xlu0 %v2380_v26, %s2251_s14  ;;  %v618_v11 = vpop.permute.xlu0 %617 }
  0xd0   : > { %v627_v21 = vsel %vm625_vm7, %v2527_v19, %v618_v11 }
  0xd1   : > { %853 = vrot.lane.b32.xlu1 %v686_v59, %s2250_s13  ;;  %905 = vrot.lane.b32.xlu2 %v776_v60, %s2250_s13 }
  0xd4   : > { %v2599_v10 = vpop.permute.xlu2 %699 }
  0xd5   : > { %v2610_v23 = vpop.permute.xlu1 %619 }
  0xd6   : > { %v628_v33 = vsel %vm625_vm7, %v618_v11, %v2610_v23 }
  0xd7   : > { %875 = vrot.lane.b32.xlu0 %v710_v42, %s2250_s13  ;;  %v716_v31 = vpop.permute.xlu0 %715 }
  0xd8   : > { %v724_v38 = vsel %vm721_vm4, %v2553_v44, %v716_v31  ;;  %v2200_v44 = vld [vmem:[%s2338_s26 + $0x20] sm:$0xf]  ;;  %v725_v54 = vsel %vm721_vm4, %v716_v31, %v2592_v2 }
  0xd9   : > { %665 = vrot.lane.b32.xlu1 %v2041_v7, %s2252_s15  ;;  %863 = vrot.lane.b32.xlu2 %v692_v46, %s2250_s13  ;;  %v2103_v46 = vld [vmem:[%s2338_s26 + $0x50] sm:$0xf0] }
  0xdc   : > { %v2612_v27 = vpop.permute.xlu2 %681 }
  0xdd   : > { %v2623_v30 = vpop.permute.xlu1 %751 }
  0xdf   : > { %841 = vrot.lane.b32.xlu0 %v668_v20, %s2250_s13 }
  0xe1   : > { %843 = vrot.lane.b32.xlu1 %v669_v12, %s2250_s13  ;;  %829 = vrot.lane.b32.xlu2 %v627_v21, %s2250_s13  ;;  %v707_v12 = vsel %vm703_vm5, %v2582_v57, %v2599_v10 }
  0xe4   : > { %v2625_v32 = vpop.permute.xlu2 %621 }
  0xe5   : > { %v782_v36 = vpop.permute.xlu1 %781  ;;  %v629_v57 = vsel %vm625_vm7, %v2610_v23, %v2625_v32 }
  0xe7   : > { %789 = vrot.lane.b32.xlu0 %v2500_v4, %s2245_s27  ;;  %v780_v4 = vpop.permute.xlu0 %779  ;;  %s2210_s27 = smul.u32 80, %s3264_s18 }
  0xe8   : > { %v791_v47 = vsel %vm469_vm0, %v780_v4, %v782_v36 }
  0xe9   : > { %893 = vrot.lane.b32.xlu1 %v758_v28, %s2250_s13  ;;  %907 = vrot.lane.b32.xlu2 %v777_v29, %s2250_s13  ;;  %s3236_s12 = scalar_lea.vmem %s3262_s11, %s2210_s27 }
  0xed   : > { %v2639_v39 = vpop.permute.xlu2 %785  ;;  %v784_v40 = vpop.permute.xlu1 %783 }
  0xee   : > { %v792_v62 = vsel %vm469_vm0, %v782_v36, %v784_v40  ;;  %v793_v23 = vsel %vm469_vm0, %v784_v40, %v2639_v39 }
  0xef   : > { %831 = vrot.lane.b32.xlu0 %v628_v33, %s2250_s13  ;;  %v680_v42 = vpop.permute.xlu0 %679 }
  0xf0   : > { %v688_v63 = vsel %vm480_vm1, %v2573_v52, %v680_v42  ;;  %v689_v11 = vsel %vm480_vm1, %v680_v42, %v2612_v27 }
  0xf1   : > { %851 = vrot.lane.b32.xlu1 %v674_v51, %s2250_s13  ;;  %819 = vrot.lane.b32.xlu2 %v2446_v49, %s2250_s13  ;;  %v759_v49 = vsel %vm755_vm3, %v2558_v45, %v2623_v30  ;;  %v2657_v45 = vor.u32 %v2200_v44, %v2103_v46 }
  0xf5   : > { %v772_v48 = vpop.permute.xlu1 %771 }
  0xf6   : > { %v778_v29 = vsel %vm773_vm2, %v2568_v50, %v772_v48 }
  0xf7   : > { %881 = vrot.lane.b32.xlu0 %v724_v38, %s2250_s13 }
  0xf9   : > { %817 = vrot.lane.b32.xlu1 %v2376_v24, %s2250_s13  ;;  %869 = vrot.lane.b32.xlu2 %v706_v37, %s2250_s13  ;;  %v626_v24 = vsel %vm625_vm7, %v2496_v1, %v2527_v19  ;;  %v2101_v1 = vld [vmem:[%s2338_s26 + $0x1c] sm:$0xf]  ;;  %v2203_v19 = vld [vmem:[%s2338_s26 + $0x4c] sm:$0xf0] }
  0xfa   : > { %v2668_v53 = vor.u32 %v2203_v19, %v2101_v1 }
  0xff   : > { %839 = vrot.lane.b32.xlu0 %v2549_v41, %s2250_s13  ;;  %v662_v41 = vpop.permute.xlu0 %661 }
 0x100   : > { %v670_v31 = vsel %vm667_vm6, %v2594_v9, %v662_v41 }
 0x101   : > { %895 = vrot.lane.b32.xlu1 %v759_v49, %s2250_s13  ;;  %827 = vrot.lane.b32.xlu2 %v626_v24, %s2250_s13 }
 0x103   : > { %v2653_v43 = vpop.permute.xlu2 %891 }
 0x107   : > { %911 = vrot.lane.b32.xlu0 %v780_v4, %s2250_s13 }
 0x109   : > { %913 = vrot.lane.b32.xlu1 %v791_v47, %s2250_s13  ;;  %1362 = vrot.lane.b32.xlu2 %v2657_v45, %s2253_s20 }
 0x10b   : > { %v2666_v51 = vpop.permute.xlu2 %877 }
 0x10f   : > { %883 = vrot.lane.b32.xlu0 %v725_v54, %s2250_s13 }
 0x111   : > { %1360 = vrot.lane.b32.xlu1 %v2668_v53, %s2253_s20  ;;  %815 = vrot.lane.b32.xlu2 %v2378_v25, %s2250_s13  ;;  %v902_v58 = vpop.permute.xlu0 %901 }
 0x113   : > { %v904_v55 = vpop.permute.xlu1 %903  ;;  %v2677_v59 = vpop.permute.xlu2 %701 }
 0x114   : > { %v959_v60 = vsel %vm703_vm5, %v902_v58, %v904_v55 }
 0x115   : > { %1044 = vmatpush.bf16.msrb.mxu3 %v959_v60 }
 0x117   : > { %857 = vrot.lane.b32.xlu0 %v688_v63, %s2250_s13 }
 0x119   : > { %915 = vrot.lane.b32.xlu1 %v792_v62, %s2250_s13  ;;  %1339 = vrot.lane.b32.xlu2 %v2657_v45, %s2254_s21  ;;  %v754_v3 = vpop.permute.xlu0 %753 }
 0x11a   : > { %v760_v44 = vsel %vm755_vm3, %v2623_v30, %v754_v3 }
 0x11b   : > { %v2687_v25 = vpop.permute.xlu1 %663  ;;  %v888_v7 = vpop.permute.xlu2 %887 }
 0x11c   : > { %v671_v24 = vsel %vm667_vm6, %v662_v41, %v2687_v25 }
 0x11f   : > { %871 = vrot.lane.b32.xlu0 %v707_v12, %s2250_s13  ;;  %v2073_v12 = vld [vmem:[%s2338_s26] sm:$0xf] }
 0x121   : > { %1337 = vrot.lane.b32.xlu1 %v2668_v53, %s2254_s21  ;;  %859 = vrot.lane.b32.xlu2 %v689_v11, %s2250_s13  ;;  %v2698_v20 = vpop.permute.xlu0 %787 }
 0x123   : > { %v890_v52 = vpop.permute.xlu1 %889  ;;  %v2700_v21 = vpop.permute.xlu2 %855 }
 0x124   : > { %v954_v28 = vsel %vm703_vm5, %v890_v52, %v2653_v43  ;;  %v953_v42 = vsel %vm703_vm5, %v888_v7, %v890_v52  ;;  %v2075_v7 = vld [vmem:[%s2338_s26 + $0x34] sm:$0xf0] }
 0x125   : > { %1045 = vmatpush.bf16.msrb.mxu3 %v954_v28 }
 0x127   : > { %845 = vrot.lane.b32.xlu0 %v670_v31, %s2250_s13 }
 0x129   : > { %909 = vrot.lane.b32.xlu1 %v778_v29, %s2250_s13  ;;  %833 = vrot.lane.b32.xlu2 %v629_v57, %s2250_s13  ;;  %v720_v36 = vpop.permute.xlu0 %719 }
 0x12a   : > { %v726_v46 = vsel %vm721_vm4, %v2592_v2, %v720_v36  ;;  %v794_v2 = vsel %vm469_vm0, %v2639_v39, %v2698_v20  ;;  %v2204_v39 = vld [vmem:[%s2338_s26 + $0x54] sm:$0xf0] }
 0x12b   : > { %v2714_v33 = vpop.permute.xlu1 %623  ;;  %v2716_v4 = vpop.permute.xlu2 %905 }
 0x12c   : > { %v2720_v50 = vsel %vm703_vm5, %v904_v55, %v2716_v4 }
 0x12f   : > { %1290 = vrot.lane.b32.xlu0 %v2346_v8, %s2255_s22 }
 0x131   : > { %1292 = vrot.lane.b32.xlu1 %v2362_v17, %s2255_s22  ;;  %917 = vrot.lane.b32.xlu2 %v793_v23, %s2250_s13  ;;  %v2729_v37 = vpop.permute.xlu0 %879 }
 0x132   : > { %v949_v40 = vsel %vm703_vm5, %v2666_v51, %v2729_v37 }
 0x133   : > { %v900_v9 = vpop.permute.xlu1 %899  ;;  %v864_v38 = vpop.permute.xlu2 %863  ;;  %1046 = vmatpush.bf16.msrb.mxu3 %v949_v40 }
 0x134   : > { %v958_v49 = vsel %vm703_vm5, %v900_v9, %v902_v58  ;;  %v2201_v9 = vld [vmem:[%s2338_s26 + $0x28] sm:$0xf] }
 0x135   : > { %1016 = vmatpush.bf16.msrb.mxu1 %v958_v49 }
 0x137   : > { %897 = vrot.lane.b32.xlu0 %v760_v44, %s2250_s13 }
 0x139   : > { %847 = vrot.lane.b32.xlu1 %v671_v24, %s2250_s13  ;;  %1017 = vmatpush.bf16.msrb.mxu1 %v953_v42  ;;  %v866_v1 = vpop.permute.xlu0 %865 }
 0x13a   : > { %885 = vrot.lane.b32.xlu2 %v726_v46, %s2250_s13  ;;  %v943_v3 = vsel %vm703_vm5, %v864_v38, %v866_v1  ;;  %v2111_v38 = vld [vmem:[%s2338_s26 + $0x58] sm:$0xf0] }
 0x13b   : > { %v2745_v47 = vpop.permute.xlu1 %867  ;;  %v2747_v19 = vpop.permute.xlu2 %829  ;;  %v2827_v44 = vor.u32 %v2201_v9, %v2111_v38  ;;  %v2081_v38 = vld [vmem:[%s2338_s26 + $0x8] sm:$0xf] }
 0x13c   : > { %v944_v48 = vsel %vm703_vm5, %v866_v1, %v2745_v47 }
 0x13d   : > { %1047 = vmatpush.bf16.msrb.mxu3 %v944_v48 }
 0x13f   : > { %919 = vrot.lane.b32.xlu0 %v794_v2, %s2250_s13  ;;  %v2202_v2 = vld [vmem:[%s2338_s26 + $0x30] sm:$0xf] }
 0x141   : > { %821 = vrot.lane.b32.xlu1 %v2459_v56, %s2250_s13  ;;  %v684_v41 = vpop.permute.xlu0 %683  ;;  %v630_v56 = vsel %vm625_vm7, %v2625_v32, %v2714_v33  ;;  %v708_v32 = vsel %vm703_vm5, %v2599_v10, %v2677_v59 }
 0x142   : > { %1270 = vrot.lane.b32.xlu2 %v2362_v17, %s2248_s30  ;;  %v2109_v17 = vld [vmem:[%s2338_s26 + $0x24] sm:$0xf] }
 0x143   : > { %v854_v30 = vpop.permute.xlu1 %853  ;;  %v2759_v54 = vpop.permute.xlu2 %907  ;;  %v2777_v63 = vor.u32 %v2204_v39, %v2109_v17  ;;  %v2205_v17 = vld [vmem:[%s2338_s26 + $0x5c] sm:$0xf0] }
 0x144   : > { %v939_v55 = vsel %vm703_vm5, %v854_v30, %v2700_v21 }
 0x145   : > { %1048 = vmatpush.bf16.msrb.mxu3 %v939_v55 }
 0x147   : > { %835 = vrot.lane.b32.xlu0 %v630_v56, %s2250_s13 }
 0x149   : > { %1268 = vrot.lane.b32.xlu1 %v2346_v8, %s2248_s30  ;;  %v876_v60 = vpop.permute.xlu0 %875 }
 0x14a   : > { %823 = vrot.lane.b32.xlu2 %v2398_v35, %s2250_s13  ;;  %v948_v8 = vsel %vm703_vm5, %v876_v60, %v2666_v51  ;;  %v690_v35 = vsel %vm480_vm1, %v2612_v27, %v684_v41  ;;  %v2193_v51 = vld [vmem:[%s2338_s26 + $0x4] sm:$0xf]  ;;  %v2195_v27 = vld [vmem:[%s2338_s26 + $0x30] sm:$0xf0] }
 0x14b   : > { %v666_v58 = vpop.permute.xlu1 %665  ;;  %v2773_v62 = vpop.permute.xlu2 %819  ;;  %1018 = vmatpush.bf16.msrb.mxu1 %v948_v8  ;;  %v2799_v59 = vor.u32 %v2193_v51, %v2075_v7  ;;  %v2801_v29 = vor.u32 %v2195_v27, %v2073_v12  ;;  %v2173_v7 = vld [vmem:[%s3254_s3 + $0x4] sm:$0xf]  ;;  %v2062_v12 = vld [vmem:[%s3254_s3 + $0x8] sm:$0xf0] }
 0x14c   : > { %v672_v46 = vsel %vm667_vm6, %v2687_v25, %v666_v58 }
 0x14f   : > { %873 = vrot.lane.b32.xlu0 %v708_v32, %s2250_s13  ;;  %1019 = vmatpush.bf16.msrb.mxu1 %v943_v3 }
 0x151   : > { %1364 = vrot.lane.b32.xlu1 %v2777_v63, %s2253_s20  ;;  %v842_v52 = vpop.permute.xlu0 %841 }
 0x152   : > { %861 = vrot.lane.b32.xlu2 %v690_v35, %s2250_s13 }
 0x153   : > { %v2791_v11 = vpop.permute.xlu1 %843  ;;  %v2795_v28 = vpop.permute.xlu2 %869 }
 0x154   : > { %v934_v10 = vsel %vm703_vm5, %v842_v52, %v2791_v11 }
 0x155   : > { %1049 = vmatpush.bf16.msrb.mxu3 %v934_v10  ;;  %v2880_v10 = vor.u32 %v2173_v7, %v2062_v12 }
 0x157   : > { %1245 = vrot.lane.b32.xlu0 %v2801_v29, %s2256_s23 }
 0x159   : > { %1247 = vrot.lane.b32.xlu1 %v2799_v59, %s2256_s23  ;;  %v790_v31 = vpop.permute.xlu0 %789 }
 0x15a   : > { %1225 = vrot.lane.b32.xlu2 %v2799_v59, %s2252_s15  ;;  %v795_v1 = vsel %vm469_vm0, %v2698_v20, %v790_v31  ;;  %v2117_v20 = vld [vmem:[%s2338_s26 + $0x2c] sm:$0xf] }
 0x15b   : > { %v2809_v57 = vpop.permute.xlu1 %893  ;;  %v828_v36 = vpop.permute.xlu2 %827  ;;  %v2856_v35 = vor.u32 %v2205_v17, %v2117_v20 }
 0x15f   : > { %1341 = vrot.lane.b32.xlu0 %v2777_v63, %s2254_s21 }
 0x161   : > { %1223 = vrot.lane.b32.xlu1 %v2801_v29, %s2252_s15  ;;  %v2821_v40 = vpop.permute.xlu0 %831 }
 0x162   : > { %1294 = vrot.lane.b32.xlu2 %v2343_v6, %s2255_s22  ;;  %v929_v42 = vsel %vm703_vm5, %v2747_v19, %v2821_v40 }
 0x163   : > { %v852_v23 = vpop.permute.xlu1 %851  ;;  %v2819_v49 = vpop.permute.xlu2 %1362  ;;  %1050 = vmatpush.bf16.msrb.mxu3 %v929_v42 }
 0x164   : > { %v938_v24 = vsel %vm703_vm5, %v852_v23, %v854_v30  ;;  %v2119_v30 = vld [vmem:[%s2338_s26 + $0x60] sm:$0xf0] }
 0x165   : > { %1020 = vmatpush.bf16.msrb.mxu1 %v938_v24  ;;  %v2841_v56 = vor.u32 %v2202_v2, %v2119_v30  ;;  %v2196_v24 = vld [vmem:[%s2338_s26 + $0x38] sm:$0xf0]  ;;  %v2083_v2 = vld [vmem:[%s2338_s26 + $0x3c] sm:$0xf0] }
 0x166   : > { %v2936_v30 = vor.u32 %v2196_v24, %v2081_v38 }
 0x167   : > { %1366 = vrot.lane.b32.xlu0 %v2827_v44, %s2253_s20 }
 0x169   : > { %849 = vrot.lane.b32.xlu1 %v672_v46, %s2250_s13  ;;  %v882_v55 = vpop.permute.xlu0 %881 }
 0x16a   : > { %921 = vrot.lane.b32.xlu2 %v795_v1, %s2250_s13  ;;  %v950_v9 = vsel %vm703_vm5, %v2729_v37, %v882_v55 }
 0x16b   : > { %v818_v48 = vpop.permute.xlu1 %817  ;;  %v816_v41 = vpop.permute.xlu2 %815 }
 0x16c   : > { %v924_v25 = vsel %vm703_vm5, %v818_v48, %v2773_v62 }
 0x16d   : > { %1051 = vmatpush.bf16.msrb.mxu3 %v924_v25 }
 0x16f   : > { %1343 = vrot.lane.b32.xlu0 %v2827_v44, %s2254_s21 }
 0x171   : > { %837 = vrot.lane.b32.xlu1 %v2714_v33, %s2250_s13  ;;  %v840_v60 = vpop.permute.xlu0 %839  ;;  %v928_v33 = vsel %vm703_vm5, %v828_v36, %v2747_v19  ;;  %v923_v19 = vsel %vm703_vm5, %v816_v41, %v818_v48 }
 0x172   : > { %1370 = vrot.lane.b32.xlu2 %v2841_v56, %s2253_s20  ;;  %v933_v8 = vsel %vm703_vm5, %v840_v60, %v842_v52  ;;  %v961_v52 = vsel %vm703_vm5, %v2716_v4, %v2759_v54  ;;  %v955_v4 = vsel %vm703_vm5, %v2653_v43, %v2809_v57  ;;  %v2174_v43 = vld [vmem:[%s3254_s3 + $0x4] sm:$0xf0] }
 0x173   : > { %v2851_v39 = vpop.permute.xlu1 %895  ;;  %v2853_v58 = vpop.permute.xlu2 %1339  ;;  %1021 = vmatpush.bf16.msrb.mxu1 %v933_v8 }
 0x177   : > { %1296 = vrot.lane.b32.xlu0 %v2360_v16, %s2255_s22  ;;  %1022 = vmatpush.bf16.msrb.mxu1 %v928_v33 }
 0x179   : > { %1368 = vrot.lane.b32.xlu1 %v2856_v35, %s2253_s20  ;;  %v912_v51 = vpop.permute.xlu0 %911 }
 0x17a   : > { %1345 = vrot.lane.b32.xlu2 %v2856_v35, %s2254_s21 }
 0x17b   : > { %v914_v32 = vpop.permute.xlu1 %913  ;;  %v2866_v3 = vpop.permute.xlu2 %859  ;;  %1023 = vmatpush.bf16.msrb.mxu1 %v923_v19 }
 0x17c   : > { %v963_v27 = vsel %vm703_vm5, %v912_v51, %v914_v32  ;;  %v2199_v51 = vld [vmem:[%s2338_s26 + $0x40] sm:$0xf0] }
 0x17d   : > { %1037 = vmatpush.bf16.msrb.mxu2 %v963_v27  ;;  %v2198_v27 = vld [vmem:[%s2338_s26 + $0x14] sm:$0xf] }
 0x17f   : > { %1100 = vmatpush.bf16.msra.mxu1 %v961_v52  ;;  %825 = vrot.lane.b32.xlu0 %v2396_v34, %s2250_s13  ;;  %v2060_v34 = vld [vmem:[%s3254_s3] sm:$0xf]  ;;  %v2095_v52 = vld [vmem:[%s2338_s26 + $0x44] sm:$0xf0] }
 0x180   : > { %2066 = vmatmul.msk.bf16.vlgmr.msrb.gmra.mxu2 %vm480_vm1, %v2880_v10  ;;  %v2910_v23 = vor.u32 %v2174_v43, %v2060_v34 }
 0x181   : > { %1072 = vmatpush.bf16.msra.mxu2 %v2720_v50  ;;  %1272 = vrot.lane.b32.xlu1 %v2343_v6, %s2248_s30  ;;  %v956_v50 = vsel %vm703_vm5, %v2809_v57, %v2851_v39  ;;  %v2898_v6 = vpop.permute.xlu0 %883 }
 0x182   : > { %1385 = vrot.lane.b32.xlu2 %v2657_v45, %s2257_s29  ;;  %v951_v57 = vsel %vm703_vm5, %v882_v55, %v2898_v6  ;;  %1052 = vmatmul.bf16.vlgmr.msrb.gmra.mxu3 %v2910_v23  ;;  %v945_v45 = vsel %vm703_vm5, %v2745_v47, %v2795_v28  ;;  %v2194_v47 = vld [vmem:[%s2338_s26 + $0xc] sm:$0xf] }
 0x183   : > { %1101 = vmatpush.bf16.msra.mxu1 %v956_v50  ;;  %v2894_v31 = vpop.permute.xlu1 %1360  ;;  %v2896_v36 = vpop.permute.xlu2 %833  ;;  %v2940_v41 = vor.u32 %v2194_v47, %v2083_v2 }
 0x184   : > { %1024 = vmatmul.bf16.vlgmr.msrb.gmra.mxu1 %v2910_v23 }
 0x185   : > { %1073 = vmatpush.bf16.msra.mxu2 %v955_v4 }
 0x187   : > { %1102 = vmatpush.bf16.msra.mxu1 %v951_v57  ;;  %1347 = vrot.lane.b32.xlu0 %v2841_v56, %s2254_s21  ;;  %s2165_s21 = sshll.u32 %s3264_s18, 4 }
 0x188   : > { %s3045_s24 = scalar_lea.vmem %s3261_s10, %s2165_s21 }
 0x189   : > { %1074 = vmatpush.bf16.msra.mxu2 %v950_v9  ;;  %1383 = vrot.lane.b32.xlu1 %v2668_v53, %s2257_s29  ;;  %v858_v42 = vpop.permute.xlu0 %857 }
 0x18a   : > { %1298 = vrot.lane.b32.xlu2 %v2358_v15, %s2255_s22  ;;  %v940_v48 = vsel %vm703_vm5, %v2700_v21, %v858_v42 }
 0x18b   : > { %v916_v37 = vpop.permute.xlu1 %915  ;;  %v2925_v46 = vpop.permute.xlu2 %917 }
 0x18c   : > { %v964_v1 = vsel %vm703_vm5, %v914_v32, %v916_v37  ;;  %v965_v53 = vsel %vm703_vm5, %v916_v37, %v2925_v46  ;;  %v2093_v32 = vld [vmem:[%s2338_s26 + $0x10] sm:$0xf] }
 0x18d   : > { %1075 = vmatpush.bf16.msra.mxu2 %v945_v45  ;;  %1065 = vmatpush.bf16.msra.mxu0 %v964_v1  ;;  %v1373_v45 = vsel %vm1372_vm8, %v2894_v31, %v2819_v49 }
 0x18f   : > { %1249 = vrot.lane.b32.xlu0 %v2936_v30, %s2256_s23 }
 0x190   : > { %2067 = vmatmul.msk.bf16.vlgmr.msra.gmra.mxu0 %vm480_vm1, %v2880_v10 }
 0x191   : > { %1093 = vmatpush.bf16.msrb.mxu0 %v965_v53  ;;  %1076 = vmatpush.bf16.msra.mxu2 %v940_v48  ;;  %v2948_v21 = vpop.permute.xlu0 %871 }
 0x192   : > { %1274 = vrot.lane.b32.xlu1 %v2360_v16, %s2248_s30  ;;  %1251 = vrot.lane.b32.xlu2 %v2940_v41, %s2256_s23  ;;  %v946_v20 = vsel %vm703_vm5, %v2795_v28, %v2948_v21  ;;  %v941_v16 = vsel %vm703_vm5, %v858_v42, %v2866_v3 }
 0x193   : > { %v2946_v55 = vpop.permute.xlu1 %1337  ;;  %1103 = vmatpush.bf16.msra.mxu1 %v946_v20 }
 0x194   : > { %v886_v25 = vpop.permute.xlu2 %885 }
 0x197   : > { %1300 = vrot.lane.b32.xlu0 %v2380_v26, %s2255_s22  ;;  %1104 = vmatpush.bf16.msra.mxu1 %v941_v16 }
 0x199   : > { %v846_v60 = vpop.permute.xlu0 %845 }
 0x19a   : > { %1227 = vrot.lane.b32.xlu1 %v2936_v30, %s2252_s15  ;;  %1229 = vrot.lane.b32.xlu2 %v2940_v41, %s2252_s15  ;;  %v935_v28 = vsel %vm703_vm5, %v2791_v11, %v846_v60  ;;  %v2094_v11 = vor.u32 %v2199_v51, %v2093_v32 }
 0x19b   : > { %v910_v17 = vpop.permute.xlu1 %909  ;;  %1077 = vmatpush.bf16.msra.mxu2 %v935_v28 }
 0x19c   : > { %v2961_v8 = vpop.permute.xlu2 %1270  ;;  %v962_v33 = vsel %vm703_vm5, %v2759_v54, %v910_v17  ;;  %v930_v54 = vsel %vm703_vm5, %v2821_v40, %v2896_v36  ;;  %v2098_v40 = vor.u32 %v2198_v27, %v2095_v52 }
 0x19d   : > { %1128 = vmatpush.bf16.msra.mxu0 %v962_v33 }
 0x19f   : > { %1387 = vrot.lane.b32.xlu0 %v2777_v63, %s2257_s29  ;;  %1078 = vmatpush.bf16.msra.mxu2 %v930_v54 }
 0x1a0   : > { %2068 = vmatmul.msk.bf16.vlgmr.msrb.gmra.mxu0 %vm480_vm1, %v2880_v10 }
 0x1a1   : > { %v1291_v12 = vpop.permute.xlu0 %1290 }
 0x1a2   : > { %1389 = vrot.lane.b32.xlu1 %v2827_v44, %s2257_s29  ;;  %1253 = vrot.lane.b32.xlu2 %v2094_v11, %s2256_s23 }
 0x1a3   : > { %v2980_v7 = vpop.permute.xlu1 %1292 }
 0x1a4   : > { %v2982_v19 = vpop.permute.xlu2 %823 }
 0x1a7   : > { %1276 = vrot.lane.b32.xlu0 %v2358_v15, %s2248_s30  ;;  %v952_v15 = vsel %vm703_vm5, %v2898_v6, %v886_v25  ;;  %v571_v6 = vld [vmem:[%s3255_s4] sm:$0xff] }
 0x1a9   : > { %v898_v63 = vpop.permute.xlu0 %897 }
 0x1aa   : > { %1278 = vrot.lane.b32.xlu1 %v2380_v26, %s2248_s30  ;;  %1233 = vrot.lane.b32.xlu2 %v2098_v40, %s2252_s15  ;;  %v957_v34 = vsel %vm703_vm5, %v2851_v39, %v898_v63 }
 0x1ab   : > { %v2991_v44 = vpop.permute.xlu1 %847  ;;  %1129 = vmatpush.bf16.msra.mxu0 %v957_v34  ;;  %v2191_v34 = vld [vmem:[%s3256_s5 + $0x4] sm:$0xf] }
 0x1ac   : > { %v862_v4 = vpop.permute.xlu2 %861  ;;  %v936_v50 = vsel %vm703_vm5, %v846_v60, %v2991_v44  ;;  %v2192_v60 = vld [vmem:[%s3256_s5 + $0x4] sm:$0xf0] }
 0x1ad   : > { %1105 = vmatpush.bf16.msra.mxu1 %v936_v50  ;;  %v942_v2 = vsel %vm703_vm5, %v2866_v3, %v862_v4 }
 0x1af   : > { %1255 = vrot.lane.b32.xlu0 %v2098_v40, %s2256_s23  ;;  %1130 = vmatpush.bf16.msra.mxu0 %v952_v15  ;;  %v1173_v40 = vld [vmem:[%s3257_s6] sm:$0xff]  ;;  %v2127_v15 = vld [vmem:[%s3256_s5 + $0x8] sm:$0xf0] }
 0x1b1   : > { %v920_v43 = vpop.permute.xlu0 %919 }
 0x1b2   : > { %1231 = vrot.lane.b32.xlu1 %v2094_v11, %s2252_s15  ;;  %v966_v39 = vsel %vm703_vm5, %v2925_v46, %v920_v43  ;;  %798 = vperm.xlu2 %2234, %v571_v6  }
 0x1b3   : > { %v822_v26 = vpop.permute.xlu1 %821  ;;  %1121 = vmatpush.bf16.msra.mxu3 %v966_v39  ;;  %v3110_v39 = vpop.f32.mrf.mxu0 }
 0x1b4   : > { %v3002_v57 = vpop.permute.xlu2 %1225  ;;  %v925_v9 = vsel %vm703_vm5, %v2773_v62, %v822_v26  ;;  %v1350_v62 = vsel %vm1349_vm9, %v2946_v55, %v2853_v58  ;;  %v926_v42 = vsel %vm703_vm5, %v822_v26, %v2982_v19 }
 0x1b5   : > { %1079 = vmatpush.bf16.msra.mxu2 %v925_v9  ;;  %v3105_v9 = vor.u32 %v2191_v34, %v2127_v15 }
 0x1b6   : > { %2069 = vmatmul.msk.bf16.vlgmr.msra.gmra.mxu3 %vm480_vm1, %v2880_v10 }
 0x1b7   : > { %1428 = vmatpush.bf16.msrb.mxu3 %v1373_v45  ;;  %1391 = vrot.lane.b32.xlu0 %v2856_v35, %s2257_s29  ;;  %v572_v35 = vld [vmem:[%s3255_s4 + $0x8] sm:$0xff] }
 0x1b8   : > { %1080 = vmatmul.bf16.vlgmr.msra.gmra.mxu2 %v2910_v23 }
 0x1b9   : > { %v836_v38 = vpop.permute.xlu0 %835 }
 0x1ba   : > { %1393 = vrot.lane.b32.xlu1 %v2841_v56, %s2257_s29  ;;  %v931_v24 = vsel %vm703_vm5, %v2896_v36, %v836_v38  ;;  %v1303_v56 = vsel %vm1302_vm10, %v1291_v12, %v2980_v7 }
 0x1bb   : > { %1429 = vmatpush.bf16.msrb.mxu3 %v1350_v62  ;;  %v1269_v31 = vpop.permute.xlu1 %1268  ;;  %1106 = vmatpush.bf16.msra.mxu1 %v931_v24 }
 0x1bc   : > { %v3024_v37 = vpop.permute.xlu2 %1294  ;;  %v1280_v47 = vsel %vm755_vm3, %v1269_v31, %v2961_v8 }
 0x1bd   : > { %v1304_v28 = vsel %vm1302_vm10, %v2980_v7, %v3024_v37 }
 0x1bf   : > { %1430 = vmatpush.bf16.msrb.mxu3 %v1303_v56  ;;  %803 = vperm.xlu0 %2233, %v572_v35   ;;  %v1174_v56 = vld [vmem:[%s3257_s6 + $0x8] sm:$0xff]  ;;  %v495_v35 = vpop.f32.mrf.mxu0 }
 0x1c0   : > { %1107 = vmatpush.bf16.msra.mxu1 %v926_v42  ;;  %1413 = vperm.xlu2 %2234, %v1174_v56  }
 0x1c1   : > { %v874_v1 = vpop.permute.xlu0 %873 }
 0x1c2   : > { %1408 = vperm.xlu1 %2235, %v1173_v40   ;;  %v494_v40 = vadd.f32 %v3110_v39, %v2494_v0 }
 0x1c3   : > { %1431 = vmatpush.bf16.msrb.mxu3 %v2515_v14  ;;  %v3037_v46 = vpop.permute.xlu1 %1364  ;;  %1108 = vmatmul.bf16.vlgmr.msra.gmra.mxu1 %v2910_v23  ;;  %v947_v14 = vsel %vm703_vm5, %v2948_v21, %v874_v1 }
 0x1c4   : > { %v922_v36 = vpop.permute.xlu2 %921  ;;  %v1374_v53 = vsel %vm1372_vm8, %v2819_v49, %v3037_v46  ;;  %1131 = vmatpush.bf16.msra.mxu0 %v947_v14  ;;  %v1583_v49 = vld [vmem:[%s3045_s24] sm:$0xff] }
 0x1c5   : > { %v967_v48 = vsel %vm703_vm5, %v920_v43, %v922_v36 }
 0x1c6   : > { %1149 = vmatpush.bf16.msrb.mxu2 %v967_v48 }
 0x1c7   : > { %1432 = vmatpush.bf16.msrb.mxu3 %v1280_v47  ;;  %1667 = vperm.xlu0 %2233, %v1583_v49   ;;  %v3137_v48 = vpop.f32.mrf.mxu0 }
 0x1c8   : > { %1132 = vmatpush.bf16.msra.mxu0 %v942_v2  ;;  %v507_v2 = vpop.f32.mrf.mxu1 }
 0x1c9   : > { %2070 = vmatmul.msk.bf16.vlgmr.msrb.gmra.mxu2 %vm480_vm1, %v2880_v10  ;;  %v1246_v25 = vpop.permute.xlu0 %1245  ;;  %v2125_v10 = vld [vmem:[%s3256_s5] sm:$0xf] }
 0x1ca   : > { %1456 = vmatpush.bf16.msra.mxu2 %v1374_v53  ;;  %v3069_v33 = vor.u32 %v2192_v60, %v2125_v10 }
 0x1cb   : > { %v1248_v55 = vpop.permute.xlu1 %1247 }
 0x1cc   : > { %v1258_v21 = vsel %vm1257_vm11, %v1246_v25, %v1248_v55  ;;  %v3081_v54 = vpop.permute.xlu2 %1370 }
 0x1cd   : > { %1433 = vmatpush.bf16.msrb.mxu3 %v1258_v21 }
 0x1cf   : > { %v551_v60 = vpop.f32.mrf.mxu0 }
 0x1d1   : > { %v1342_v16 = vpop.permute.xlu0 %1341 }
 0x1d2   : > { %v1351_v3 = vsel %vm1349_vm9, %v2853_v58, %v1342_v16 }
 0x1d3   : > { %v1224_v20 = vpop.permute.xlu1 %1223  ;;  %1457 = vmatpush.bf16.msra.mxu2 %v1351_v3 }
 0x1d4   : > { %v1235_v17 = vsel %vm667_vm6, %v1224_v20, %v3002_v57 }
 0x1d5   : > { %1434 = vmatpush.bf16.msrb.mxu3 %v1235_v17 }
 0x1d7   : > { %1458 = vmatpush.bf16.msra.mxu2 %v1304_v28 }
 0x1d9   : > { %1435 = vmatpush.bf16.msrb.mxu3 %v2801_v29  ;;  %v3075_v58 = vpop.permute.xlu0 %1366  ;;  %v3086_v29 = vpop.permute.xlu2 %1345 }
 0x1db   : > { %v850_v32 = vpop.permute.xlu1 %849  ;;  %1459 = vmatpush.bf16.msra.mxu2 %v2518_v18 }
 0x1dc   : > { %v937_v51 = vsel %vm703_vm5, %v2991_v44, %v850_v32  ;;  %1436 = vmatmul.bf16.vlgmr.msrb.gmra.mxu3 %v3069_v33 }
 0x1dd   : > { %1133 = vmatpush.bf16.msra.mxu0 %v937_v51  ;;  %v1584_v51 = vld [vmem:[%s3045_s24 + $0x8] sm:$0xff] }
 0x1de   : > { %1672 = vperm.xlu1 %2235, %v1584_v51  }
 0x1e1   : > { %v3083_v12 = vpop.permute.xlu0 %1343  ;;  %v1386_v18 = vpop.permute.xlu2 %1385 }
 0x1e2   : > { %v1352_v45 = vsel %vm1349_vm9, %v1342_v16, %v3083_v12  ;;  %v1353_v16 = vsel %vm1349_vm9, %v3083_v12, %v3086_v29 }
 0x1e3   : > { %v838_v11 = vpop.permute.xlu1 %837 }
 0x1e4   : > { %v932_v7 = vsel %vm703_vm5, %v836_v38, %v838_v11 }
 0x1e5   : > { %1134 = vmatpush.bf16.msra.mxu0 %v932_v7  ;;  %v496_v7 = vadd.f32 %v495_v35, %v2506_v5 }
 0x1e9   : > { %v3088_v52 = vpop.permute.xlu0 %1296 }
 0x1ea   : > { %v1305_v38 = vsel %vm1302_vm10, %v3024_v37, %v3088_v52 }
 0x1eb   : > { %v1369_v27 = vpop.permute.xlu1 %1368 }
 0x1ec   : > { %v1377_v21 = vsel %vm1372_vm8, %v1369_v27, %v3081_v54  ;;  %v509_v54 = vpop.f32.mrf.mxu1 }
 0x1f1   : > { %v826_v63 = vpop.permute.xlu0 %825 }
 0x1f2   : > { %v927_v50 = vsel %vm703_vm5, %v2982_v19, %v826_v63  ;;  %v1375_v19 = vsel %vm1372_vm8, %v3037_v46, %v3075_v58 }
 0x1f3   : > { %v1273_v44 = vpop.permute.xlu1 %1272  ;;  %1135 = vmatpush.bf16.msra.mxu0 %v927_v50 }
 0x1f4   : > { %v1281_v4 = vsel %vm755_vm3, %v2961_v8, %v1273_v44 }
 0x1f5   : > { %1460 = vmatpush.bf16.msra.mxu2 %v1281_v4  ;;  %v559_v4 = vmax.f32 %v496_v7, 0.0 }
 0x1f6   : > { %1136 = vmatmul.bf16.vlgmr.msra.gmra.mxu0 %v2910_v23  ;;  %v1299_v23 = vpop.permute.xlu2 %1298 }
 0x1f7   : > { %v1306_v28 = vsel %vm1302_vm10, %v3088_v52, %v1299_v23 }
 0x1f9   : > { %v1348_v43 = vpop.permute.xlu0 %1347 }
 0x1fa   : > { %v1354_v17 = vsel %vm1349_vm9, %v3086_v29, %v1348_v43 }
 0x1fb   : > { %v1384_v26 = vpop.permute.xlu1 %1383 }
 0x1fc   : > { %v1396_v8 = vsel %vm1395_vm12, %v1384_v26, %v1386_v18  ;;  %v554_v26 = vmax.f32 %v494_v40, 0.0 }
 0x1fd   : > { %1449 = vmatpush.bf16.msrb.mxu1 %v1396_v8  ;;  %v510_v8 = vadd.f32 %v509_v54, %v2506_v5 }
 0x1fe   : > { %v3122_v24 = vpop.permute.xlu2 %1251 }
 0x200   : > { %2131 = vmatmul.msk.bf16.vlgmr.msrb.gmra.mxu1 %vm480_vm1, %v3105_v9 }
 0x201   : > { %1484 = vmatpush.bf16.msra.mxu1 %v1375_v19  ;;  %v1250_v62 = vpop.permute.xlu0 %1249 }
 0x202   : > { %v1259_v31 = vsel %vm1257_vm11, %v1248_v55, %v1250_v62  ;;  %v1260_v53 = vsel %vm1257_vm11, %v1250_v62, %v3122_v24  ;;  %v535_v55 = vpop.f32.mrf.mxu3  ;;  %v508_v62 = vadd.f32 %v507_v2, %v2494_v0 }
 0x203   : > { %1461 = vmatpush.bf16.msra.mxu2 %v1259_v31  ;;  %v536_v43 = vadd.f32 %v535_v55, %v2494_v0  ;;  %v564_v31 = vpack.c.bf16 %v559_v4, %v554_v26 }
 0x204   : > { %v3116_v6 = vpop.permute.xlu1 %1274  ;;  %v555_v2 = vmax.f32 %v508_v62, 0.0 }
 0x205   : > { %1485 = vmatpush.bf16.msra.mxu1 %v1352_v45  ;;  %v1282_v37 = vsel %vm755_vm3, %v1273_v44, %v3116_v6 }
 0x206   : > { %v3132_v1 = vpop.permute.xlu2 %1229 }
 0x209   : > { %1486 = vmatpush.bf16.msra.mxu1 %v1305_v38  ;;  %v1301_v46 = vpop.permute.xlu0 %1300 }
 0x20c   : > { %v1228_v42 = vpop.permute.xlu1 %1227 }
 0x20d   : > { %1487 = vmatpush.bf16.msra.mxu1 %v2482_v61  ;;  %v1236_v36 = vsel %vm667_vm6, %v3002_v57, %v1228_v42  ;;  %v521_v57 = vpop.f32.mrf.mxu2  ;;  %v1237_v25 = vsel %vm667_vm6, %v1228_v42, %v3132_v1  ;;  %v1067_v52 = vpop.f32.mrf.mxu0 }
 0x20e   : > { %1462 = vmatpush.bf16.msra.mxu2 %v1236_v36  ;;  %v1254_v20 = vpop.permute.xlu2 %1253  ;;  %v2089_v36 = vld [vmem:[%s2338_s26 + $0x10] sm:$0xf] }
 0x20f   : > { %v1261_v19 = vsel %vm1257_vm11, %v3122_v24, %v1254_v20  ;;  %v550_v24 = vadd.f32 %v3137_v48, %v2494_v0 }
 0x211   : > { %1488 = vmatpush.bf16.msra.mxu1 %v1282_v37  ;;  %v1388_v14 = vpop.permute.xlu0 %1387  ;;  %v2197_v37 = vld [vmem:[%s2338_s26 + $0x40] sm:$0xf0] }
 0x212   : > { %1463 = vmatpush.bf16.msra.mxu2 %v2799_v59  ;;  %v1397_v47 = vsel %vm1395_vm12, %v1386_v18, %v1388_v14  ;;  %v1376_v59 = vsel %vm1372_vm8, %v3075_v58, %v1369_v27  ;;  %v1307_v58 = vsel %vm1302_vm10, %v1299_v23, %v1301_v46  ;;  %v552_v23 = vadd.f32 %v551_v60, %v2506_v5 }
 0x213   : > { %1477 = vmatpush.bf16.msrb.mxu0 %v1397_v47 }
 0x214   : > { %v3139_v61 = vpop.permute.xlu1 %1389 }
 0x215   : > { %1489 = vmatpush.bf16.msra.mxu1 %v1260_v53  ;;  %1464 = vmatmul.bf16.vlgmr.msra.gmra.mxu2 %v3069_v33  ;;  %v1398_v49 = vsel %vm1395_vm12, %v1388_v14, %v3139_v61  ;;  %v523_v32 = vpop.f32.mrf.mxu2  ;;  %v557_v14 = vmax.f32 %v536_v43, 0.0 }
 0x216   : > { %1505 = vmatpush.bf16.msra.mxu3 %v1398_v49  ;;  %2132 = vmatmul.msk.bf16.vlgmr.msrb.gmra.mxu0 %vm480_vm1, %v3105_v9  ;;  %v1234_v11 = vpop.permute.xlu2 %1233  ;;  %v524_v27 = vadd.f32 %v523_v32, %v2506_v5  ;;  %v563_v49 = vmax.f32 %v552_v23, 0.0 }
 0x217   : > { %1512 = vmatpush.bf16.msra.mxu0 %v1376_v59  ;;  %v2090_v59 = vor.u32 %v2197_v37, %v2089_v36 }
 0x218   : > { %v561_v15 = vmax.f32 %v524_v27, 0.0  ;;  %v2206_v27 = vld [vmem:[%s3258_s7] sm:$0xff] }
 0x219   : > { %1490 = vmatpush.bf16.msra.mxu1 %v1237_v25  ;;  %2133 = vmatmul.msk.bf16.vlgmr.msra.gmra.mxu3 %vm480_vm1, %v3105_v9  ;;  %v1277_v10 = vpop.permute.xlu0 %1276  ;;  %v558_v25 = vmax.f32 %v550_v24, 0.0 }
 0x21a   : > { %1540 = vmatpush.bf16.msrb.mxu3 %v1377_v21  ;;  %v1283_v44 = vsel %vm755_vm3, %v3116_v6, %v1277_v10 }
 0x21b   : > { %1513 = vmatpush.bf16.msra.mxu0 %v1353_v16 }
 0x21c   : > { %v1279_v3 = vpop.permute.xlu1 %1278 }
 0x21d   : > { %1491 = vmatpush.bf16.msra.mxu1 %v2936_v30  ;;  %v537_v30 = vpop.f32.mrf.mxu3  ;;  %v1284_v18 = vsel %vm755_vm3, %v1277_v10, %v1279_v3  ;;  %v1039_v63 = vpop.f32.mrf.mxu2 }
 0x21e   : > { %1541 = vmatpush.bf16.msrb.mxu3 %v1354_v17  ;;  %v538_v50 = vadd.f32 %v537_v30, %v2506_v5  ;;  %v3184_v35 = vpop.permute.xlu2 %798  ;;  %v568_v17 = vpack.c.bf16 %v563_v49, %v558_v25 }
 0x21f   : > { %1514 = vmatpush.bf16.msra.mxu0 %v1306_v28 }
 0x220   : > { %1492 = vmatmul.bf16.vlgmr.msra.gmra.mxu1 %v3069_v33  ;;  %v562_v38 = vmax.f32 %v538_v50, 0.0 }
 0x221   : > { %v1256_v29 = vpop.permute.xlu0 %1255 }
 0x222   : > { %1542 = vmatpush.bf16.msrb.mxu3 %v1307_v58  ;;  %v1262_v39 = vsel %vm1257_vm11, %v1254_v20, %v1256_v29  ;;  %v567_v55 = vpack.c.bf16 %v562_v38, %v557_v14 }
 0x223   : > { %1515 = vmatpush.bf16.msra.mxu0 %v2511_v13  ;;  %v522_v13 = vadd.f32 %v521_v57, %v2494_v0  ;;  %v560_v57 = vmax.f32 %v510_v8, 0.0 }
 0x224   : > { %v1232_v12 = vpop.permute.xlu1 %1231 }
 0x225   : > { %v1053_v34 = vpop.f32.mrf.mxu3  ;;  %v556_v6 = vmax.f32 %v522_v13, 0.0  ;;  %v1239_v46 = vsel %vm667_vm6, %v1232_v12, %v1234_v11  ;;  %v1238_v47 = vsel %vm667_vm6, %v3132_v1, %v1232_v12  ;;  %v1041_v1 = vpop.f32.mrf.mxu2  ;;  %v565_v21 = vpack.c.bf16 %v560_v57, %v555_v2 }
 0x226   : > { %1543 = vmatpush.bf16.msrb.mxu3 %v2530_v22  ;;  %v1025_v22 = vpop.f32.mrf.mxu1  ;;  %v1054_v48 = vadd.f32 %v1053_v34, %v3184_v35  ;;  %v1414_v57 = vpop.permute.xlu2 %1413 }
 0x227   : > { %1516 = vmatpush.bf16.msra.mxu0 %v1283_v44  ;;  %v566_v53 = vpack.c.bf16 %v561_v15, %v556_v6  ;;  %v1026_v0 = vadd.f32 %v1025_v22, %v3184_v35 }
 0x228   : > { %v1068_v10 = vadd.f32 %v1067_v52, %v1054_v48 }
 0x229   : > { %v1392_v56 = vpop.permute.xlu0 %1391  ;;  %v1040_v3 = vadd.f32 %v1039_v63, %v1026_v0 }
 0x22a   : > { %1544 = vmatpush.bf16.msrb.mxu3 %v1284_v18  ;;  %v1399_v5 = vsel %vm1395_vm12, %v3139_v61, %v1392_v56  ;;  %v1069_v61 = vpop.f32.mrf.mxu0  ;;  %v1157_v54 = vmax.f32 %v1068_v10, 0.0 }
 0x22b   : > { %1517 = vmatpush.bf16.msra.mxu0 %v1261_v19  ;;  %1533 = vmatpush.bf16.msrb.mxu2 %v1399_v5 }
 0x22c   : > { %v1394_v45 = vpop.permute.xlu1 %1393 }
 0x22d   : > { %v1400_v42 = vsel %vm1395_vm12, %v1392_v56, %v1394_v45  ;;  %v1055_v16 = vpop.f32.mrf.mxu3  ;;  %v2207_v45 = vld [vmem:[%s3259_s8] sm:$0xff] }
 0x22e   : > { %1545 = vmatpush.bf16.msrb.mxu3 %v1262_v39  ;;  %1561 = vmatpush.bf16.msrb.mxu1 %v1400_v42  ;;  %v1027_v20 = vpop.f32.mrf.mxu1 }
 0x22f   : > { %1518 = vmatpush.bf16.msra.mxu0 %v1238_v47  ;;  %1602 = vmatpush.bf16.msra.mxu2 %v564_v31 }
 0x230   : > { %2134 = vmatmul.msk.bf16.vlgmr.msrb.gmra.mxu2 %vm480_vm1, %v3105_v9 }
 0x231   : > { %2135 = vmatmul.msk.bf16.vlgmr.msrb.gmra.mxu1 %vm480_vm1, %v3105_v9  ;;  %v804_v60 = vpop.permute.xlu0 %803  ;;  %v1156_v9 = vmax.f32 %v1040_v3, 0.0 }
 0x232   : > { %1546 = vmatpush.bf16.msrb.mxu3 %v1239_v46  ;;  %1630 = vmatpush.bf16.msra.mxu1 %v566_v53  ;;  %v1028_v28 = vadd.f32 %v1027_v20, %v804_v60  ;;  %v1056_v32 = vadd.f32 %v1055_v16, %v804_v60  ;;  %v1095_v12 = vpop.f32.mrf.mxu0  ;;  %v2208_v20 = vld [vmem:[%s3260_s9] sm:$0xff] }
 0x233   : > { %1644 = vmatpush.bf16.msrb.mxu2 %v567_v55  ;;  %1519 = vmatpush.bf16.msra.mxu0 %v2940_v41 }
 0x234   : > { %v1042_v58 = vadd.f32 %v1041_v1, %v1028_v28  ;;  %v1070_v51 = vadd.f32 %v1069_v61, %v1056_v32  ;;  %v1409_v5 = vpop.permute.xlu1 %1408 }
 0x236   : > { %1547 = vmatpush.bf16.msrb.mxu3 %v2090_v59  ;;  %1520 = vmatmul.bf16.vlgmr.msra.gmra.mxu0 %v3069_v33  ;;  %v1161_v30 = vmax.f32 %v1042_v58, 0.0  ;;  %v1162_v11 = vmax.f32 %v1070_v51, 0.0 }
 0x237   : > { %1616 = vmatpush.bf16.msrb.mxu0 %v565_v21 }
 0x238   : > { %v1166_v41 = vpack.c.bf16 %v1161_v30, %v1156_v9  ;;  %v1167_v7 = vpack.c.bf16 %v1162_v11, %v1157_v54 }
 0x239   : > { %1548 = vmatmul.bf16.vlgmr.msrb.gmra.mxu3 %v3069_v33  ;;  %v1123_v40 = vpop.f32.mrf.mxu3 }
 0x23a   : > { %1658 = vmatpush.bf16.msra.mxu3 %v568_v17  ;;  %1716 = vmatpush.bf16.msrb.mxu1 %v1167_v7  ;;  %v1097_v63 = vpop.f32.mrf.mxu0 }
 0x23b   : > { %v1081_v29 = vpop.f32.mrf.mxu2  ;;  %1702 = vmatpush.bf16.msra.mxu0 %v1166_v41 }
 0x23c   : > { %v1082_v52 = vadd.f32 %v1081_v29, %v3184_v35 }
 0x23e   : > { %v1096_v33 = vadd.f32 %v1095_v12, %v1082_v52 }
 0x240   : > { %2140 = vmatmul.msk.bf16.vlgmr.msra.gmra.mxu2 %vm480_vm1, %v2206_v27  ;;  %v1109_v44 = vpop.f32.mrf.mxu1  ;;  %v1158_v50 = vmax.f32 %v1096_v33, 0.0 }
 0x241   : > { %2142 = vmatmul.msk.bf16.vlgmr.msra.gmra.mxu1 %vm480_vm1, %v2206_v27  ;;  %v1110_v4 = vadd.f32 %v1109_v44, %v3184_v35  ;;  %v1125_v8 = vpop.f32.mrf.mxu3 }
 0x243   : > { %v1083_v18 = vpop.f32.mrf.mxu2  ;;  %v1124_v15 = vadd.f32 %v1123_v40, %v1110_v4 }
 0x244   : > { %v1084_v13 = vadd.f32 %v1083_v18, %v804_v60 }
 0x245   : > { %v1159_v23 = vmax.f32 %v1124_v15, 0.0 }
 0x246   : > { %v1098_v22 = vadd.f32 %v1097_v63, %v1084_v13  ;;  %2141 = vmatmul.msk.bf16.vlgmr.msrb.gmra.mxu0 %vm480_vm1, %v2206_v27 }
 0x248   : > { %v1163_v34 = vmax.f32 %v1098_v22, 0.0  ;;  %v1111_v43 = vpop.f32.mrf.mxu1 }
 0x249   : > { %2144 = vmatmul.msk.bf16.vlgmr.msra.gmra.mxu3 %vm480_vm1, %v2206_v27  ;;  %v1112_v19 = vadd.f32 %v1111_v43, %v804_v60 }
 0x24a   : > { %v1168_v26 = vpack.c.bf16 %v1163_v34, %v1158_v50 }
 0x24b   : > { %v1126_v39 = vadd.f32 %v1125_v8, %v1112_v19 }
 0x24c   : > { %1730 = vmatpush.bf16.msra.mxu2 %v1168_v26  ;;  %v1151_v31 = vpop.f32.mrf.mxu2 }
 0x24d   : > { %v1164_v6 = vmax.f32 %v1126_v39, 0.0 }
 0x24f   : > { %v1169_v62 = vpack.c.bf16 %v1164_v6, %v1159_v23 }
 0x250   : > { %2143 = vmatmul.msk.bf16.vlgmr.msrb.gmra.mxu2 %vm480_vm1, %v2206_v27 }
 0x251   : > { %2150 = vmatmul.msk.bf16.vlgmr.msrb.gmra.mxu1 %vm480_vm1, %v2207_v45  ;;  %1744 = vmatpush.bf16.msrb.mxu3 %v1169_v62 }
 0x254   : > { %v1153_v37 = vpop.f32.mrf.mxu2 }
 0x256   : > { %2149 = vmatmul.msk.bf16.vlgmr.msra.gmra.mxu0 %vm480_vm1, %v2207_v45 }
 0x259   : > { %2152 = vmatmul.msk.bf16.vlgmr.msrb.gmra.mxu3 %vm480_vm1, %v2207_v45 }
 0x25f   : > { %v1437_v38 = vpop.f32.mrf.mxu3 }
 0x260   : > { %2151 = vmatmul.msk.bf16.vlgmr.msra.gmra.mxu2 %vm480_vm1, %v2207_v45  ;;  %v1438_v53 = vadd.f32 %v1437_v38, %v1409_v5 }
 0x267   : > { %v1439_v47 = vpop.f32.mrf.mxu3 }
 0x268   : > { %v1440_v48 = vadd.f32 %v1439_v47, %v1414_v57 }
 0x273   : > { %v1137_v56 = vpop.f32.mrf.mxu0 }
 0x274   : > { %v1138_v24 = vadd.f32 %v1137_v56, %v3184_v35 }
 0x276   : > { %v1152_v42 = vadd.f32 %v1151_v31, %v1138_v24 }
 0x278   : > { %v1160_v49 = vmax.f32 %v1152_v42, 0.0 }
 0x27b   : > { %v1139_v36 = vpop.f32.mrf.mxu0 }
 0x27c   : > { %v1140_v14 = vadd.f32 %v1139_v36, %v804_v60 }
 0x27d   : > { %v1451_v46 = vpop.f32.mrf.mxu1 }
 0x27e   : > { %v1154_v0 = vadd.f32 %v1153_v37, %v1140_v14  ;;  %v1452_v61 = vadd.f32 %v1451_v46, %v1438_v53 }
 0x280   : > { %v1165_v2 = vmax.f32 %v1154_v0, 0.0  ;;  %v1568_v1 = vmax.f32 %v1452_v61, 0.0  ;;  %v1668_v0 = vpop.permute.xlu0 %1667 }
 0x282   : > { %v1170_v55 = vpack.c.bf16 %v1165_v2, %v1160_v49 }
 0x284   : > { %1758 = vmatpush.bf16.msrb.mxu0 %v1170_v55 }
 0x285   : > { %v1453_v59 = vpop.f32.mrf.mxu1 }
 0x286   : > { %v1454_v25 = vadd.f32 %v1453_v59, %v1440_v48 }
 0x287   : > { %2153 = vmatmul.msk.bf16.vlgmr.msrb.gmra.mxu0 %vm480_vm1, %v2207_v45 }
 0x288   : > { %v1573_v35 = vmax.f32 %v1454_v25, 0.0 }
 0x28a   : > { %v1578_v21 = vpack.c.bf16 %v1573_v35, %v1568_v1  ;;  %v1673_v35 = vpop.permute.xlu1 %1672 }
 0x28c   : > { %1792 = vmatpush.bf16.msra.mxu1 %v1578_v21 }
 0x28f   : > { %2158 = vmatmul.msk.bf16.vlgmr.msra.gmra.mxu1 %vm480_vm1, %v2208_v20 }
 0x293   : > { %v1479_v16 = vpop.f32.mrf.mxu0 }
 0x298   : > { %v1465_v17 = vpop.f32.mrf.mxu2 }
 0x299   : > { %v1466_v3 = vadd.f32 %v1465_v17, %v1409_v5 }
 0x29b   : > { %v1480_v28 = vadd.f32 %v1479_v16, %v1466_v3  ;;  %v1481_v9 = vpop.f32.mrf.mxu0 }
 0x29c   : > { %v1507_v60 = vpop.f32.mrf.mxu3 }
 0x29d   : > { %v1493_v10 = vpop.f32.mrf.mxu1  ;;  %v1569_v54 = vmax.f32 %v1480_v28, 0.0 }
 0x29e   : > { %v1494_v32 = vadd.f32 %v1493_v10, %v1409_v5 }
 0x2a0   : > { %v1467_v58 = vpop.f32.mrf.mxu2  ;;  %v1508_v30 = vadd.f32 %v1507_v60, %v1494_v32 }
 0x2a1   : > { %v1468_v51 = vadd.f32 %v1467_v58, %v1414_v57 }
 0x2a2   : > { %v1570_v27 = vmax.f32 %v1508_v30, 0.0 }
 0x2a3   : > { %v1482_v11 = vadd.f32 %v1481_v9, %v1468_v51 }
 0x2a4   : > { %v1509_v29 = vpop.f32.mrf.mxu3 }
 0x2a5   : > { %v1495_v12 = vpop.f32.mrf.mxu1  ;;  %v1574_v41 = vmax.f32 %v1482_v11, 0.0 }
 0x2a6   : > { %v1496_v7 = vadd.f32 %v1495_v12, %v1414_v57 }
 0x2a7   : > { %v1579_v52 = vpack.c.bf16 %v1574_v41, %v1569_v54 }
 0x2a8   : > { %v1510_v40 = vadd.f32 %v1509_v29, %v1496_v7 }
 0x2a9   : > { %1806 = vmatpush.bf16.msrb.mxu2 %v1579_v52 }
 0x2aa   : > { %v1575_v33 = vmax.f32 %v1510_v40, 0.0 }
 0x2ac   : > { %v1580_v44 = vpack.c.bf16 %v1575_v33, %v1570_v27  ;;  %2159 = vmatmul.msk.bf16.vlgmr.msrb.gmra.mxu2 %vm480_vm1, %v2208_v20 }
 0x2ae   : > { %1820 = vmatpush.bf16.msra.mxu3 %v1580_v44  ;;  %v1563_v4 = vpop.f32.mrf.mxu1 }
 0x2b1   : > { %2160 = vmatmul.msk.bf16.vlgmr.msra.gmra.mxu3 %vm480_vm1, %v2208_v20 }
 0x2b3   : > { %v1521_v18 = vpop.f32.mrf.mxu0  ;;  %v1535_v63 = vpop.f32.mrf.mxu2 }
 0x2b4   : > { %v1522_v13 = vadd.f32 %v1521_v18, %v1409_v5 }
 0x2b6   : > { %v1536_v34 = vadd.f32 %v1535_v63, %v1522_v13  ;;  %v1565_v31 = vpop.f32.mrf.mxu1 }
 0x2b8   : > { %v1571_v19 = vmax.f32 %v1536_v34, 0.0 }
 0x2bb   : > { %v1523_v22 = vpop.f32.mrf.mxu0  ;;  %v1537_v26 = vpop.f32.mrf.mxu2 }
 0x2bc   : > { %v1549_v50 = vpop.f32.mrf.mxu3  ;;  %v1524_v15 = vadd.f32 %v1523_v22, %v1414_v57 }
 0x2bd   : > { %v1550_v8 = vadd.f32 %v1549_v50, %v1409_v5 }
 0x2be   : > { %v1538_v43 = vadd.f32 %v1537_v26, %v1524_v15  ;;  %v1632_v46 = vpop.f32.mrf.mxu1 }
 0x2bf   : > { %v1564_v6 = vadd.f32 %v1563_v4, %v1550_v8  ;;  %v1677_v12 = vadd.f32 %v1668_v0, %v1632_v46 }
 0x2c0   : > { %v1576_v23 = vmax.f32 %v1538_v43, 0.0 }
 0x2c1   : > { %v1572_v56 = vmax.f32 %v1564_v6, 0.0 }
 0x2c2   : > { %v1581_v39 = vpack.c.bf16 %v1576_v23, %v1571_v19 }
 0x2c3   : > { %v1618_v36 = vpop.f32.mrf.mxu0  ;;  %v1604_v37 = vpop.f32.mrf.mxu2 }
 0x2c4   : > { %v1551_v45 = vpop.f32.mrf.mxu3  ;;  %1834 = vmatpush.bf16.msra.mxu0 %v1581_v39  ;;  %v1675_v61 = vadd.f32 %v1668_v0, %v1604_v37  ;;  %v1676_v54 = vadd.f32 %v1668_v0, %v1618_v36 }
 0x2c5   : > { %v1552_v62 = vadd.f32 %v1551_v45, %v1414_v57 }
 0x2c6   : > { %v1634_v5 = vpop.f32.mrf.mxu1 }
 0x2c7   : > { %v1566_v38 = vadd.f32 %v1565_v31, %v1552_v62  ;;  %2161 = vmatmul.msk.bf16.vlgmr.msra.gmra.mxu0 %vm480_vm1, %v2208_v20  ;;  %v1682_v13 = vadd.f32 %v1673_v35, %v1634_v5 }
 0x2c9   : > { %v1577_v24 = vmax.f32 %v1566_v38, 0.0 }
 0x2cb   : > { %v1582_v42 = vpack.c.bf16 %v1577_v24, %v1572_v56  ;;  %v1620_v14 = vpop.f32.mrf.mxu0  ;;  %v1606_v47 = vpop.f32.mrf.mxu2 }
 0x2cc   : > { %v1660_v55 = vpop.f32.mrf.mxu3  ;;  %v1681_v40 = vadd.f32 %v1673_v35, %v1620_v14 }
 0x2cd   : > { %1848 = vmatpush.bf16.msrb.mxu1 %v1582_v42  ;;  %v1679_v6 = vadd.f32 %v1668_v0, %v1660_v55 }
 0x2ce   : > { %v1718_v53 = vpop.f32.mrf.mxu1 }
 0x2cf   : > { %v1766_v30 = vadd.f32 %v1718_v53, %v1676_v54 }
 0x2d0   : > { %2162 = vmatmul.msk.bf16.vlgmr.msrb.gmra.mxu1 %vm480_vm1, %v2208_v20  ;;  %v1680_v20 = vadd.f32 %v1673_v35, %v1606_v47 }
 0x2d3   : > { %v1704_v49 = vpop.f32.mrf.mxu0  ;;  %v1646_v48 = vpop.f32.mrf.mxu2 }
 0x2d4   : > { %v1765_v2 = vadd.f32 %v1704_v49, %v1675_v61  ;;  %v1662_v60 = vpop.f32.mrf.mxu3  ;;  %v1678_v8 = vadd.f32 %v1668_v0, %v1646_v48 }
 0x2d5   : > { %v1684_v37 = vadd.f32 %v1673_v35, %v1662_v60 }
 0x2d6   : > { %v1720_v57 = vpop.f32.mrf.mxu1 }
 0x2d7   : > { %v1771_v44 = vadd.f32 %v1720_v57, %v1681_v40 }
 0x2db   : > { %v1706_v21 = vpop.f32.mrf.mxu0  ;;  %v1648_v16 = vpop.f32.mrf.mxu2 }
 0x2dc   : > { %v1770_v17 = vadd.f32 %v1706_v21, %v1680_v20  ;;  %v1746_v58 = vpop.f32.mrf.mxu3  ;;  %v1683_v62 = vadd.f32 %v1673_v35, %v1648_v16 }
 0x2dd   : > { %v1768_v19 = vadd.f32 %v1746_v58, %v1678_v8 }
 0x2e3   : > { %v1732_v32 = vpop.f32.mrf.mxu2 }
 0x2e4   : > { %v1748_v51 = vpop.f32.mrf.mxu3  ;;  %v1767_v7 = vadd.f32 %v1732_v32, %v1677_v12 }
 0x2e5   : > { %v1773_v38 = vadd.f32 %v1748_v51, %v1683_v62 }
 0x2eb   : > { %v1734_v9 = vpop.f32.mrf.mxu2 }
 0x2ec   : > { %v1772_v50 = vadd.f32 %v1734_v9, %v1682_v13 }
 0x304   : > { %v1760_v27 = vpop.f32.mrf.mxu0 }
 0x305   : > { %v1769_v31 = vadd.f32 %v1760_v27, %v1679_v6 }
 0x30c   : > { %v1794_v59 = vpop.f32.mrf.mxu1  ;;  %v1762_v26 = vpop.f32.mrf.mxu0 }
 0x30d   : > { %v1855_v25 = vadd.f32 %v1794_v59, %v1765_v2  ;;  %v1774_v53 = vadd.f32 %v1762_v26, %v1684_v37 }
 0x30f   : > { %v1865_v1 = vmax.f32 %v1855_v25, 0.0 }
 0x311   : > { %1875 = vst [vmem:[%s3236_s12] sm:$0xff] %v1865_v1 }
 0x314   : > { %v1796_v3 = vpop.f32.mrf.mxu1 }
 0x315   : > { %v1860_v10 = vadd.f32 %v1796_v3, %v1770_v17 }
 0x317   : > { %v1870_v28 = vmax.f32 %v1860_v10, 0.0 }
 0x319   : > { %1880 = vst [vmem:[%s3236_s12 + $0x28] sm:$0xff] %v1870_v28 }
 0x32f   : > { %v1808_v11 = vpop.f32.mrf.mxu2 }
 0x330   : > { %v1856_v41 = vadd.f32 %v1808_v11, %v1766_v30 }
 0x332   : > { %v1866_v29 = vmax.f32 %v1856_v41, 0.0 }
 0x334   : > { %v1822_v52 = vpop.f32.mrf.mxu3  ;;  %1876 = vst [vmem:[%s3236_s12 + $0x8] sm:$0xff] %v1866_v29 }
 0x335   : > { %v1857_v33 = vadd.f32 %v1822_v52, %v1767_v7 }
 0x337   : > { %v1867_v18 = vmax.f32 %v1857_v33, 0.0  ;;  %v1810_v63 = vpop.f32.mrf.mxu2 }
 0x338   : > { %v1861_v4 = vadd.f32 %v1810_v63, %v1771_v44 }
 0x339   : > { %1877 = vst [vmem:[%s3236_s12 + $0x10] sm:$0xff] %v1867_v18 }
 0x33a   : > { %v1871_v22 = vmax.f32 %v1861_v4, 0.0 }
 0x33c   : > { %v1824_v34 = vpop.f32.mrf.mxu3  ;;  %1881 = vst [vmem:[%s3236_s12 + $0x30] sm:$0xff] %v1871_v22 }
 0x33d   : > { %v1862_v15 = vadd.f32 %v1824_v34, %v1772_v50 }
 0x33f   : > { %v1872_v43 = vmax.f32 %v1862_v15, 0.0 }
 0x341   : > { %1882 = vst [vmem:[%s3236_s12 + $0x38] sm:$0xff] %v1872_v43 }
 0x344   : > { %v1836_v23 = vpop.f32.mrf.mxu0 }
 0x345   : > { %v1858_v39 = vadd.f32 %v1836_v23, %v1768_v19 }
 0x347   : > { %v1868_v45 = vmax.f32 %v1858_v39, 0.0 }
 0x349   : > { %1878 = vst [vmem:[%s3236_s12 + $0x18] sm:$0xff] %v1868_v45 }
 0x34c   : > { %v1838_v42 = vpop.f32.mrf.mxu0 }
 0x34d   : > { %v1850_v56 = vpop.f32.mrf.mxu1  ;;  %v1863_v46 = vadd.f32 %v1838_v42, %v1773_v38 }
 0x34e   : > { %v1859_v24 = vadd.f32 %v1850_v56, %v1769_v31 }
 0x34f   : > { %v1873_v36 = vmax.f32 %v1863_v46, 0.0 }
 0x350   : > { %v1869_v5 = vmax.f32 %v1859_v24, 0.0 }
 0x351   : > { %1883 = vst [vmem:[%s3236_s12 + $0x40] sm:$0xff] %v1873_v36 }
 0x352   : > { %1879 = vst [vmem:[%s3236_s12 + $0x20] sm:$0xff] %v1869_v5 }
 0x355   : > { %v1852_v14 = vpop.f32.mrf.mxu1 }
 0x356   : > { %v1864_v47 = vadd.f32 %v1852_v14, %v1774_v53 }
 0x358   : > { %v1874_v57 = vmax.f32 %v1864_v47, 0.0 }
 0x35a   : > { %1884 = vst [vmem:[%s3236_s12 + $0x48] sm:$0xff] %v1874_v57 }
 0x35b PF: > { %s21_s17 = sadd.s32 1, %s2242_s17  }
 0x35c   : > { %p18_p4 = scmp.ge.s32.totalorder %s21_s17, 4  }
 0x35e   :  { %20 = sbr.rel (!%p18_p4) target bundleno = 1 (0x1), region = 97 }

</bundles_post_ra>
